<compile_context>
chip_gen: v6e
topology: v6e:2x2x1
jax: 0.10.0
libtpu: 0.0.40
codegen_flags: <defaults>
</compile_context>

<pallas_src>
import math

import jax
import jax.numpy as jnp
from jax.experimental import pallas as pl
from jax.experimental.pallas import tpu as pltpu

# ---------------- small synthetic RoBERTa config ----------------
B = 2                 # batch
S = 8                 # sequence length
H = 128               # hidden_size
NUM_HEADS = 4
HEAD_DIM = H // NUM_HEADS
INTER = 256           # intermediate_size
NUM_BLOCKS = 9        # module arg -> layers used = 2 * (9 // 2) = 8
NUM_LAYERS = 2 * (NUM_BLOCKS // 2)
NUM_LABELS = 3
CLS_PAD = 128         # lane-dense padded logits width
VOCAB = 100
MAX_POS = 40
TYPE_VOCAB = 2
PAD_IDX = 1           # roberta padding_idx
LN_EPS = 1e-5


# ---------------- in-kernel helpers ----------------
def _layer_norm(x, gamma, beta):
    mean = jnp.mean(x, axis=-1, keepdims=True)
    var = jnp.mean((x - mean) ** 2, axis=-1, keepdims=True)
    return (x - mean) * jax.lax.rsqrt(var + LN_EPS) * gamma + beta


# ---------------- fused Pallas kernel ----------------
def fused_kernel(emb_ref, mask_ref, eg_ref, eb_ref,
                 wqkv_ref, bqkv_ref, wo_ref, bo_ref, g1_ref, be1_ref,
                 wi_ref, bi_ref, w2_ref, bf2_ref, g2_ref, be2_ref,
                 cw1_ref, cb1_ref, cw2_ref, cb2_ref,
                 out_ref, h_ref):
    l = pl.program_id(1)          # layer index (sequential / "arbitrary" axis)

    # ---- step 0: embeddings sum was precomputed outside; LayerNorm it here
    @pl.when(l == 0)
    def _():
        h_ref[...] = _layer_norm(emb_ref[0], eg_ref[...], eb_ref[...])

    x = h_ref[...]                               # [S, H] f32 residual stream
    xb = x.astype(jnp.bfloat16)

    # ---- fused QKV projection (bf16 MXU operands, f32 accumulation)
    qkv = jnp.dot(xb, wqkv_ref[0],
                  preferred_element_type=jnp.float32) + bqkv_ref[0]   # [S, 3H]

    # ---- multi-head self-attention (softmax math kept in f32)
    scale = 1.0 / math.sqrt(HEAD_DIM)
    mask_row = mask_ref[0]                       # [1, S] raw 0/1 mask (ADDED)

    scores = []
    for hh in range(NUM_HEADS):
        lo = hh * HEAD_DIM
        qh = qkv[:, lo:lo + HEAD_DIM]            # [S, HEAD_DIM]
        kh = qkv[:, H + lo:H + lo + HEAD_DIM]
        scores.append(jnp.einsum("qd,kd->qk", qh, kh,
                                 preferred_element_type=jnp.float32))
    s = jnp.stack(scores, axis=0) * scale        # [NH, S, S]
    s = s + mask_row[None]                       # broadcast of [B,1,1,S] mask (hoisted)
    s = s - jnp.max(s, axis=-1, keepdims=True)   # one softmax over all heads
    p = jnp.exp(s)
    p = p * pl.reciprocal(jnp.sum(p, axis=-1, keepdims=True), approx=True)

    ctx_heads = []
    for hh in range(NUM_HEADS):
        lo = 2 * H + hh * HEAD_DIM
        vh = qkv[:, lo:lo + HEAD_DIM]
        ctx_heads.append(jnp.dot(p[hh], vh, preferred_element_type=jnp.float32))
    ctx = jnp.concatenate(ctx_heads, axis=-1)    # [S, H]

    attn = jnp.dot(ctx.astype(jnp.bfloat16), wo_ref[0],
                   preferred_element_type=jnp.float32) + bo_ref[0]
    x1 = _layer_norm(attn + x, g1_ref[0], be1_ref[0])

    # ---- FFN with exact (erf) GELU
    inter = jnp.dot(x1.astype(jnp.bfloat16), wi_ref[0],
                    preferred_element_type=jnp.float32) + bi_ref[0]
    inter = 0.5 * inter * (1.0 + jax.lax.erf(inter * (1.0 / math.sqrt(2.0))))
    ffn = jnp.dot(inter.astype(jnp.bfloat16), w2_ref[0],
                  preferred_element_type=jnp.float32) + bf2_ref[0]
    x2 = _layer_norm(ffn + x1, g2_ref[0], be2_ref[0])
    h_ref[...] = x2                              # carried in VMEM to next layer

    # ---- last layer: RobertaClassificationHead on the <s> (CLS) token
    @pl.when(l == NUM_LAYERS - 1)
    def _():
        cls = x2[0:1, :]                         # [1, H]
        hcls = jnp.tanh(
            jnp.dot(cls.astype(jnp.bfloat16), cw1_ref[...],
                    preferred_element_type=jnp.float32) + cb1_ref[...])
        logits = jnp.dot(hcls.astype(jnp.bfloat16), cw2_ref[...],
                         preferred_element_type=jnp.float32) + cb2_ref[...]
        out_ref[...] = logits[None]              # [1, 1, CLS_PAD] lane-dense write


# ---------------- forward pass wrapper ----------------
def roberta_forward(input_ids, attention_mask, params):
    # RoBERTa padding-aware position ids + embedding gathers (plain-JAX glue)
    nonpad = (input_ids != PAD_IDX).astype(jnp.int32)
    position_ids = jnp.cumsum(nonpad, axis=1) * nonpad + PAD_IDX
    we = jnp.take(params["word_emb"], input_ids, axis=0)        # [B, S, H]
    pe = jnp.take(params["pos_emb"], position_ids, axis=0)      # [B, S, H]
    te = params["tok_emb"][0][None, None, :]                    # token_type_id = 0
    emb_sum = we + pe + te                                      # [B, S, H]
    mask3 = attention_mask.astype(jnp.float32)[:, None, :]      # [B, 1, S]

    lmap = lambda b, l: (l, 0, 0)    # per-layer stacked weight slabs
    bmap = lambda b, l: (b, 0, 0)    # per-batch activations / outputs
    cmap = lambda b, l: (0, 0)       # grid-invariant 2-D params

    in_specs = [
        pl.BlockSpec((1, S, H), bmap),          # emb_sum
        pl.BlockSpec((1, 1, S), bmap),          # attention mask
        pl.BlockSpec((1, H), cmap),             # emb LN gamma
        pl.BlockSpec((1, H), cmap),             # emb LN beta
        pl.BlockSpec((1, H, 3 * H), lmap),      # wqkv
        pl.BlockSpec((1, 1, 3 * H), lmap),      # bqkv
        pl.BlockSpec((1, H, H), lmap),          # wo
        pl.BlockSpec((1, 1, H), lmap),          # bo
        pl.BlockSpec((1, 1, H), lmap),          # ln1 gamma
        pl.BlockSpec((1, 1, H), lmap),          # ln1 beta
        pl.BlockSpec((1, H, INTER), lmap),      # wi
        pl.BlockSpec((1, 1, INTER), lmap),      # bi
        pl.BlockSpec((1, INTER, H), lmap),      # w2
        pl.BlockSpec((1, 1, H), lmap),          # b2
        pl.BlockSpec((1, 1, H), lmap),          # ln2 gamma
        pl.BlockSpec((1, 1, H), lmap),          # ln2 beta
        pl.BlockSpec((H, H), cmap),             # classifier dense W
        pl.BlockSpec((1, H), cmap),             # classifier dense b
        pl.BlockSpec((H, CLS_PAD), cmap),       # classifier out_proj W (lane padded)
        pl.BlockSpec((1, CLS_PAD), cmap),       # classifier out_proj b (lane padded)
    ]

    logits_pad = pl.pallas_call(
        fused_kernel,
        out_shape=jax.ShapeDtypeStruct((B, 1, CLS_PAD), jnp.float32),
        grid_spec=pltpu.PrefetchScalarGridSpec(
            num_scalar_prefetch=0,
            grid=(B, NUM_LAYERS),
            in_specs=in_specs,
            out_specs=pl.BlockSpec((1, 1, CLS_PAD), bmap),
            scratch_shapes=[pltpu.VMEM((S, H), jnp.float32)],   # resident hidden state
        ),
        compiler_params=pltpu.CompilerParams(
            dimension_semantics=("parallel", "arbitrary")),
    )(emb_sum, mask3, params["emb_ln_g"], params["emb_ln_b"],
      params["wqkv"], params["bqkv"], params["wo"], params["bo"],
      params["ln1_g"], params["ln1_b"], params["wi"], params["bi"],
      params["w2"], params["b2"], params["ln2_g"], params["ln2_b"],
      params["cls_w1"], params["cls_b1"], params["cls_w2"], params["cls_b2"])

    return logits_pad[:, 0, :NUM_LABELS]


# ---------------- parameter init (deterministic, synthetic) ----------------
def init_params(key):
    keys = jax.random.split(key, 10)

    def nrm(kk, shape, dtype=jnp.float32):
        return (jax.random.normal(kk, shape, jnp.float32) * 0.02).astype(dtype)

    cls_w2 = jnp.zeros((H, CLS_PAD), jnp.float32).at[:, :NUM_LABELS].set(
        nrm(keys[8], (H, NUM_LABELS)))

    return {
        "word_emb": nrm(keys[0], (VOCAB, H)),
        "pos_emb": nrm(keys[1], (MAX_POS, H)),
        "tok_emb": nrm(keys[2], (TYPE_VOCAB, H)),
        "emb_ln_g": jnp.ones((1, H), jnp.float32),
        "emb_ln_b": jnp.zeros((1, H), jnp.float32),
        # stacked per-layer slabs: weight matrices bf16 (MXU), biases / LN f32
        "wqkv": nrm(keys[3], (NUM_LAYERS, H, 3 * H), jnp.bfloat16),
        "bqkv": jnp.zeros((NUM_LAYERS, 1, 3 * H), jnp.float32),
        "wo": nrm(keys[4], (NUM_LAYERS, H, H), jnp.bfloat16),
        "bo": jnp.zeros((NUM_LAYERS, 1, H), jnp.float32),
        "ln1_g": jnp.ones((NUM_LAYERS, 1, H), jnp.float32),
        "ln1_b": jnp.zeros((NUM_LAYERS, 1, H), jnp.float32),
        "wi": nrm(keys[5], (NUM_LAYERS, H, INTER), jnp.bfloat16),
        "bi": jnp.zeros((NUM_LAYERS, 1, INTER), jnp.float32),
        "w2": nrm(keys[6], (NUM_LAYERS, INTER, H), jnp.bfloat16),
        "b2": jnp.zeros((NUM_LAYERS, 1, H), jnp.float32),
        "ln2_g": jnp.ones((NUM_LAYERS, 1, H), jnp.float32),
        "ln2_b": jnp.zeros((NUM_LAYERS, 1, H), jnp.float32),
        "cls_w1": nrm(keys[7], (H, H), jnp.bfloat16),
        "cls_b1": jnp.zeros((1, H), jnp.float32),
        "cls_w2": cls_w2.astype(jnp.bfloat16),
        "cls_b2": jnp.zeros((1, CLS_PAD), jnp.float32),
    }


if __name__ == "__main__":
    key = jax.random.PRNGKey(0)
    k_param, k_ids = jax.random.split(key)

    params = init_params(k_param)

    input_ids = jax.random.randint(k_ids, (B, S), 2, VOCAB, dtype=jnp.int32)
    # emulate: <s> token at position 0, padding at the last 2 positions of row 1
    input_ids = input_ids.at[:, 0].set(0)
    input_ids = input_ids.at[1, -2:].set(PAD_IDX)
    attention_mask = (input_ids != PAD_IDX).astype(jnp.int32)

    logits = jax.jit(roberta_forward)(input_ids, attention_mask, params)
    logits = jax.block_until_ready(logits)
    assert logits.shape == (B, NUM_LABELS)
    print("KERNEL_OK")
</pallas_src>

<mosaic_0001>
module attributes {stable_mosaic.version = 11 : i64} {
  func.func @fused_kernel(%arg0: i32, %arg1: i32, %arg2: memref<1x8x128xf32, #tpu.memory_space<vmem>>, %arg3: memref<1x1x8xf32, #tpu.memory_space<vmem>>, %arg4: memref<1x128xf32, #tpu.memory_space<vmem>>, %arg5: memref<1x128xf32, #tpu.memory_space<vmem>>, %arg6: memref<1x128x384xbf16, #tpu.memory_space<vmem>>, %arg7: memref<1x1x384xf32, #tpu.memory_space<vmem>>, %arg8: memref<1x128x128xbf16, #tpu.memory_space<vmem>>, %arg9: memref<1x1x128xf32, #tpu.memory_space<vmem>>, %arg10: memref<1x1x128xf32, #tpu.memory_space<vmem>>, %arg11: memref<1x1x128xf32, #tpu.memory_space<vmem>>, %arg12: memref<1x128x256xbf16, #tpu.memory_space<vmem>>, %arg13: memref<1x1x256xf32, #tpu.memory_space<vmem>>, %arg14: memref<1x256x128xbf16, #tpu.memory_space<vmem>>, %arg15: memref<1x1x128xf32, #tpu.memory_space<vmem>>, %arg16: memref<1x1x128xf32, #tpu.memory_space<vmem>>, %arg17: memref<1x1x128xf32, #tpu.memory_space<vmem>>, %arg18: memref<128x128xbf16, #tpu.memory_space<vmem>>, %arg19: memref<1x128xf32, #tpu.memory_space<vmem>>, %arg20: memref<128x128xbf16, #tpu.memory_space<vmem>>, %arg21: memref<1x128xf32, #tpu.memory_space<vmem>>, %arg22: memref<1x1x128xf32, #tpu.memory_space<vmem>>, %arg23: memref<8x128xf32, #tpu.memory_space<vmem>>) attributes {dimension_semantics = [#tpu.dimension_semantics<parallel>, #tpu.dimension_semantics<arbitrary>], iteration_bounds = array<i64: 2, 8>, scalar_prefetch = 0 : i64, scratch_operands = 1 : i64, tpu.core_type = #tpu.core_type<tc>, window_params = [{transform_indices = @transform_0, window_bounds = array<i64: 1, 8, 128>}, {transform_indices = @transform_1, window_bounds = array<i64: 1, 1, 8>}, {pipeline_mode = #tpu.pipeline_mode<synchronous>, transform_indices = @transform_2, window_bounds = array<i64: 1, 128>}, {pipeline_mode = #tpu.pipeline_mode<synchronous>, transform_indices = @transform_3, window_bounds = array<i64: 1, 128>}, {transform_indices = @transform_4, window_bounds = array<i64: 1, 128, 384>}, {transform_indices = @transform_5, window_bounds = array<i64: 1, 1, 384>}, {transform_indices = @transform_6, window_bounds = array<i64: 1, 128, 128>}, {transform_indices = @transform_7, window_bounds = array<i64: 1, 1, 128>}, {transform_indices = @transform_8, window_bounds = array<i64: 1, 1, 128>}, {transform_indices = @transform_9, window_bounds = array<i64: 1, 1, 128>}, {transform_indices = @transform_10, window_bounds = array<i64: 1, 128, 256>}, {transform_indices = @transform_11, window_bounds = array<i64: 1, 1, 256>}, {transform_indices = @transform_12, window_bounds = array<i64: 1, 256, 128>}, {transform_indices = @transform_13, window_bounds = array<i64: 1, 1, 128>}, {transform_indices = @transform_14, window_bounds = array<i64: 1, 1, 128>}, {transform_indices = @transform_15, window_bounds = array<i64: 1, 1, 128>}, {pipeline_mode = #tpu.pipeline_mode<synchronous>, transform_indices = @transform_16, window_bounds = array<i64: 128, 128>}, {pipeline_mode = #tpu.pipeline_mode<synchronous>, transform_indices = @transform_17, window_bounds = array<i64: 1, 128>}, {pipeline_mode = #tpu.pipeline_mode<synchronous>, transform_indices = @transform_18, window_bounds = array<i64: 128, 128>}, {pipeline_mode = #tpu.pipeline_mode<synchronous>, transform_indices = @transform_19, window_bounds = array<i64: 1, 128>}, {transform_indices = @transform_20, window_bounds = array<i64: 1, 1, 128>}]} {
    %c0_i32 = arith.constant 0 : i32
    %0 = arith.cmpi eq, %arg1, %c0_i32 : i32
    %1 = arith.extui %0 : i1 to i32
    %c0_i32_0 = arith.constant 0 : i32
    %2 = arith.cmpi ne, %1, %c0_i32_0 : i32
    scf.if %2 {
      %c0_71 = arith.constant 0 : index
      %c0_72 = arith.constant 0 : index
      %c0_73 = arith.constant 0 : index
      %153 = vector.load %arg2[%c0_71, %c0_72, %c0_73] : memref<1x8x128xf32, #tpu.memory_space<vmem>>, vector<1x8x128xf32>
      %154 = vector.shape_cast %153 : vector<1x8x128xf32> to vector<8x128xf32>
      %c0_74 = arith.constant 0 : index
      %c0_75 = arith.constant 0 : index
      %155 = vector.load %arg4[%c0_74, %c0_75] : memref<1x128xf32, #tpu.memory_space<vmem>>, vector<1x128xf32>
      %c0_76 = arith.constant 0 : index
      %c0_77 = arith.constant 0 : index
      %156 = vector.load %arg5[%c0_76, %c0_77] : memref<1x128xf32, #tpu.memory_space<vmem>>, vector<1x128xf32>
      %cst_78 = arith.constant dense<0.000000e+00> : vector<8xf32>
      %157 = vector.multi_reduction <add>, %154, %cst_78 [1] : vector<8x128xf32> to vector<8xf32>
      %158 = vector.shape_cast %157 : vector<8xf32> to vector<8x1xf32>
      %cst_79 = arith.constant 1.280000e+02 : f32
      %159 = vector.broadcast %cst_79 : f32 to vector<8x1xf32>
      %160 = arith.divf %158, %159 : vector<8x1xf32>
      %161 = vector.broadcast %160 : vector<8x1xf32> to vector<8x128xf32>
      %162 = arith.subf %154, %161 : vector<8x128xf32>
      %163 = arith.mulf %162, %162 : vector<8x128xf32>
      %cst_80 = arith.constant dense<0.000000e+00> : vector<8xf32>
      %164 = vector.multi_reduction <add>, %163, %cst_80 [1] : vector<8x128xf32> to vector<8xf32>
      %165 = vector.shape_cast %164 : vector<8xf32> to vector<8x1xf32>
      %cst_81 = arith.constant 1.280000e+02 : f32
      %166 = vector.broadcast %cst_81 : f32 to vector<8x1xf32>
      %167 = arith.divf %165, %166 : vector<8x1xf32>
      %168 = vector.broadcast %160 : vector<8x1xf32> to vector<8x128xf32>
      %169 = arith.subf %154, %168 : vector<8x128xf32>
      %cst_82 = arith.constant 9.99999974E-6 : f32
      %170 = vector.broadcast %cst_82 : f32 to vector<8x1xf32>
      %171 = arith.addf %167, %170 : vector<8x1xf32>
      %172 = math.rsqrt %171 : vector<8x1xf32>
      %173 = vector.broadcast %172 : vector<8x1xf32> to vector<8x128xf32>
      %174 = arith.mulf %169, %173 : vector<8x128xf32>
      %175 = vector.broadcast %155 : vector<1x128xf32> to vector<8x128xf32>
      %176 = arith.mulf %174, %175 : vector<8x128xf32>
      %177 = vector.broadcast %156 : vector<1x128xf32> to vector<8x128xf32>
      %178 = arith.addf %176, %177 : vector<8x128xf32>
      %c0_83 = arith.constant 0 : index
      %c0_84 = arith.constant 0 : index
      %179 = vector.load %arg23[%c0_83, %c0_84] : memref<8x128xf32, #tpu.memory_space<vmem>>, vector<8x128xf32>
      tpu.vector_store %arg23[%c0_83, %c0_84], %178 {strides = array<i32>} : memref<8x128xf32, #tpu.memory_space<vmem>>, vector<8x128xf32>,
    } else {
    }
    %c0 = arith.constant 0 : index
    %c0_1 = arith.constant 0 : index
    %3 = vector.load %arg23[%c0, %c0_1] : memref<8x128xf32, #tpu.memory_space<vmem>>, vector<8x128xf32>
    %4 = arith.truncf %3 : vector<8x128xf32> to vector<8x128xbf16>
    %c0_2 = arith.constant 0 : index
    %c0_3 = arith.constant 0 : index
    %c0_4 = arith.constant 0 : index
    %5 = vector.load %arg6[%c0_2, %c0_3, %c0_4] : memref<1x128x384xbf16, #tpu.memory_space<vmem>>, vector<1x128x384xbf16>
    %6 = vector.shape_cast %5 : vector<1x128x384xbf16> to vector<128x384xbf16>
    %cst = arith.constant dense<0.000000e+00> : vector<8x384xf32>
    %7 = tpu.matmul %4, %6, %cst {dimension_numbers = #tpu.dot_dimension_numbers<[1], [0], [0], [1], [0, 0, 1, 1], [], []>} : vector<8x128xbf16>, vector<128x384xbf16>, vector<8x384xf32> -> vector<8x384xf32>
    %c0_5 = arith.constant 0 : index
    %c0_6 = arith.constant 0 : index
    %c0_7 = arith.constant 0 : index
    %8 = vector.load %arg7[%c0_5, %c0_6, %c0_7] : memref<1x1x384xf32, #tpu.memory_space<vmem>>, vector<1x1x384xf32>
    %9 = vector.shape_cast %8 : vector<1x1x384xf32> to vector<1x384xf32>
    %10 = vector.broadcast %9 : vector<1x384xf32> to vector<8x384xf32>
    %11 = arith.addf %7, %10 : vector<8x384xf32>
    %c0_8 = arith.constant 0 : index
    %c0_9 = arith.constant 0 : index
    %c0_10 = arith.constant 0 : index
    %12 = vector.load %arg3[%c0_8, %c0_9, %c0_10] : memref<1x1x8xf32, #tpu.memory_space<vmem>>, vector<1x1x8xf32>
    %13 = vector.shape_cast %12 : vector<1x1x8xf32> to vector<1x8xf32>
    %14 = vector.extract_strided_slice %11 {offsets = [0, 0], sizes = [8, 32], strides = [1, 1]} : vector<8x384xf32> to vector<8x32xf32>
    %15 = vector.extract_strided_slice %11 {offsets = [0, 128], sizes = [8, 32], strides = [1, 1]} : vector<8x384xf32> to vector<8x32xf32>
    "tpu.trace_start"() <{level = 10 : i32, message = "qd,kd->qk"}> : () -> ()
    %cst_11 = arith.constant dense<0.000000e+00> : vector<8x8xf32>
    %16 = tpu.matmul %14, %15, %cst_11 {dimension_numbers = #tpu.dot_dimension_numbers<[1], [1], [0], [0], [0, 0, 1, 0], [], []>} : vector<8x32xf32>, vector<8x32xf32>, vector<8x8xf32> -> vector<8x8xf32>
    "tpu.trace_stop"() : () -> ()
    %17 = vector.extract_strided_slice %11 {offsets = [0, 32], sizes = [8, 32], strides = [1, 1]} : vector<8x384xf32> to vector<8x32xf32>
    %18 = vector.extract_strided_slice %11 {offsets = [0, 160], sizes = [8, 32], strides = [1, 1]} : vector<8x384xf32> to vector<8x32xf32>
    "tpu.trace_start"() <{level = 10 : i32, message = "qd,kd->qk"}> : () -> ()
    %cst_12 = arith.constant dense<0.000000e+00> : vector<8x8xf32>
    %19 = tpu.matmul %17, %18, %cst_12 {dimension_numbers = #tpu.dot_dimension_numbers<[1], [1], [0], [0], [0, 0, 1, 0], [], []>} : vector<8x32xf32>, vector<8x32xf32>, vector<8x8xf32> -> vector<8x8xf32>
    "tpu.trace_stop"() : () -> ()
    %20 = vector.extract_strided_slice %11 {offsets = [0, 64], sizes = [8, 32], strides = [1, 1]} : vector<8x384xf32> to vector<8x32xf32>
    %21 = vector.extract_strided_slice %11 {offsets = [0, 192], sizes = [8, 32], strides = [1, 1]} : vector<8x384xf32> to vector<8x32xf32>
    "tpu.trace_start"() <{level = 10 : i32, message = "qd,kd->qk"}> : () -> ()
    %cst_13 = arith.constant dense<0.000000e+00> : vector<8x8xf32>
    %22 = tpu.matmul %20, %21, %cst_13 {dimension_numbers = #tpu.dot_dimension_numbers<[1], [1], [0], [0], [0, 0, 1, 0], [], []>} : vector<8x32xf32>, vector<8x32xf32>, vector<8x8xf32> -> vector<8x8xf32>
    "tpu.trace_stop"() : () -> ()
    %23 = vector.extract_strided_slice %11 {offsets = [0, 96], sizes = [8, 32], strides = [1, 1]} : vector<8x384xf32> to vector<8x32xf32>
    %24 = vector.extract_strided_slice %11 {offsets = [0, 224], sizes = [8, 32], strides = [1, 1]} : vector<8x384xf32> to vector<8x32xf32>
    "tpu.trace_start"() <{level = 10 : i32, message = "qd,kd->qk"}> : () -> ()
    %cst_14 = arith.constant dense<0.000000e+00> : vector<8x8xf32>
    %25 = tpu.matmul %23, %24, %cst_14 {dimension_numbers = #tpu.dot_dimension_numbers<[1], [1], [0], [0], [0, 0, 1, 0], [], []>} : vector<8x32xf32>, vector<8x32xf32>, vector<8x8xf32> -> vector<8x8xf32>
    "tpu.trace_stop"() : () -> ()
    %26 = vector.shape_cast %16 : vector<8x8xf32> to vector<1x8x8xf32>
    %27 = vector.shape_cast %19 : vector<8x8xf32> to vector<1x8x8xf32>
    %28 = vector.shape_cast %22 : vector<8x8xf32> to vector<1x8x8xf32>
    %29 = vector.shape_cast %25 : vector<8x8xf32> to vector<1x8x8xf32>
    %30 = tpu.concatenate %26, %27, %28, %29 in 0 : vector<1x8x8xf32>, vector<1x8x8xf32>, vector<1x8x8xf32>, vector<1x8x8xf32> -> vector<4x8x8xf32>
    %cst_15 = arith.constant 0.176776692 : f32
    %31 = vector.broadcast %cst_15 : f32 to vector<4x8x8xf32>
    %32 = arith.mulf %30, %31 : vector<4x8x8xf32>
    %33 = vector.shape_cast %13 : vector<1x8xf32> to vector<1x1x8xf32>
    %34 = vector.broadcast %33 : vector<1x1x8xf32> to vector<4x8x8xf32>
    %35 = arith.addf %32, %34 : vector<4x8x8xf32>
    %cst_16 = arith.constant dense<0xFF800000> : vector<4x8xf32>
    %36 = vector.multi_reduction <maximumf>, %35, %cst_16 [2] : vector<4x8x8xf32> to vector<4x8xf32>
    %37 = vector.shape_cast %36 : vector<4x8xf32> to vector<4x8x1xf32>
    %38 = vector.broadcast %37 : vector<4x8x1xf32> to vector<4x8x8xf32>
    %39 = arith.subf %35, %38 : vector<4x8x8xf32>
    %40 = math.exp %39 : vector<4x8x8xf32>
    %cst_17 = arith.constant dense<0.000000e+00> : vector<4x8xf32>
    %41 = vector.multi_reduction <add>, %40, %cst_17 [2] : vector<4x8x8xf32> to vector<4x8xf32>
    %42 = vector.shape_cast %41 : vector<4x8xf32> to vector<4x8x1xf32>
    %43 = tpu.reciprocal %42 {approx = true} : vector<4x8x1xf32> -> vector<4x8x1xf32>
    %44 = vector.broadcast %43 : vector<4x8x1xf32> to vector<4x8x8xf32>
    %45 = arith.mulf %40, %44 : vector<4x8x8xf32>
    %46 = vector.extract_strided_slice %11 {offsets = [0, 256], sizes = [8, 32], strides = [1, 1]} : vector<8x384xf32> to vector<8x32xf32>
    %47 = vector.extract_strided_slice %45 {offsets = [0, 0, 0], sizes = [1, 8, 8], strides = [1, 1, 1]} : vector<4x8x8xf32> to vector<1x8x8xf32>
    %48 = vector.shape_cast %47 : vector<1x8x8xf32> to vector<8x8xf32>
    %cst_18 = arith.constant dense<0.000000e+00> : vector<8x32xf32>
    %49 = tpu.matmul %48, %46, %cst_18 {dimension_numbers = #tpu.dot_dimension_numbers<[1], [0], [0], [1], [0, 0, 1, 1], [], []>} : vector<8x8xf32>, vector<8x32xf32>, vector<8x32xf32> -> vector<8x32xf32>
    %50 = vector.extract_strided_slice %11 {offsets = [0, 288], sizes = [8, 32], strides = [1, 1]} : vector<8x384xf32> to vector<8x32xf32>
    %51 = vector.extract_strided_slice %45 {offsets = [1, 0, 0], sizes = [1, 8, 8], strides = [1, 1, 1]} : vector<4x8x8xf32> to vector<1x8x8xf32>
    %52 = vector.shape_cast %51 : vector<1x8x8xf32> to vector<8x8xf32>
    %cst_19 = arith.constant dense<0.000000e+00> : vector<8x32xf32>
    %53 = tpu.matmul %52, %50, %cst_19 {dimension_numbers = #tpu.dot_dimension_numbers<[1], [0], [0], [1], [0, 0, 1, 1], [], []>} : vector<8x8xf32>, vector<8x32xf32>, vector<8x32xf32> -> vector<8x32xf32>
    %54 = vector.extract_strided_slice %11 {offsets = [0, 320], sizes = [8, 32], strides = [1, 1]} : vector<8x384xf32> to vector<8x32xf32>
    %55 = vector.extract_strided_slice %45 {offsets = [2, 0, 0], sizes = [1, 8, 8], strides = [1, 1, 1]} : vector<4x8x8xf32> to vector<1x8x8xf32>
    %56 = vector.shape_cast %55 : vector<1x8x8xf32> to vector<8x8xf32>
    %cst_20 = arith.constant dense<0.000000e+00> : vector<8x32xf32>
    %57 = tpu.matmul %56, %54, %cst_20 {dimension_numbers = #tpu.dot_dimension_numbers<[1], [0], [0], [1], [0, 0, 1, 1], [], []>} : vector<8x8xf32>, vector<8x32xf32>, vector<8x32xf32> -> vector<8x32xf32>
    %58 = vector.extract_strided_slice %11 {offsets = [0, 352], sizes = [8, 32], strides = [1, 1]} : vector<8x384xf32> to vector<8x32xf32>
    %59 = vector.extract_strided_slice %45 {offsets = [3, 0, 0], sizes = [1, 8, 8], strides = [1, 1, 1]} : vector<4x8x8xf32> to vector<1x8x8xf32>
    %60 = vector.shape_cast %59 : vector<1x8x8xf32> to vector<8x8xf32>
    %cst_21 = arith.constant dense<0.000000e+00> : vector<8x32xf32>
    %61 = tpu.matmul %60, %58, %cst_21 {dimension_numbers = #tpu.dot_dimension_numbers<[1], [0], [0], [1], [0, 0, 1, 1], [], []>} : vector<8x8xf32>, vector<8x32xf32>, vector<8x32xf32> -> vector<8x32xf32>
    %62 = tpu.concatenate %49, %53, %57, %61 in 1 : vector<8x32xf32>, vector<8x32xf32>, vector<8x32xf32>, vector<8x32xf32> -> vector<8x128xf32>
    %63 = arith.truncf %62 : vector<8x128xf32> to vector<8x128xbf16>
    %c0_22 = arith.constant 0 : index
    %c0_23 = arith.constant 0 : index
    %c0_24 = arith.constant 0 : index
    %64 = vector.load %arg8[%c0_22, %c0_23, %c0_24] : memref<1x128x128xbf16, #tpu.memory_space<vmem>>, vector<1x128x128xbf16>
    %65 = vector.shape_cast %64 : vector<1x128x128xbf16> to vector<128x128xbf16>
    %cst_25 = arith.constant dense<0.000000e+00> : vector<8x128xf32>
    %66 = tpu.matmul %63, %65, %cst_25 {dimension_numbers = #tpu.dot_dimension_numbers<[1], [0], [0], [1], [0, 0, 1, 1], [], []>} : vector<8x128xbf16>, vector<128x128xbf16>, vector<8x128xf32> -> vector<8x128xf32>
    %c0_26 = arith.constant 0 : index
    %c0_27 = arith.constant 0 : index
    %c0_28 = arith.constant 0 : index
    %67 = vector.load %arg9[%c0_26, %c0_27, %c0_28] : memref<1x1x128xf32, #tpu.memory_space<vmem>>, vector<1x1x128xf32>
    %68 = vector.shape_cast %67 : vector<1x1x128xf32> to vector<1x128xf32>
    %69 = vector.broadcast %68 : vector<1x128xf32> to vector<8x128xf32>
    %70 = arith.addf %66, %69 : vector<8x128xf32>
    %71 = arith.addf %70, %3 : vector<8x128xf32>
    %c0_29 = arith.constant 0 : index
    %c0_30 = arith.constant 0 : index
    %c0_31 = arith.constant 0 : index
    %72 = vector.load %arg10[%c0_29, %c0_30, %c0_31] : memref<1x1x128xf32, #tpu.memory_space<vmem>>, vector<1x1x128xf32>
    %73 = vector.shape_cast %72 : vector<1x1x128xf32> to vector<1x128xf32>
    %c0_32 = arith.constant 0 : index
    %c0_33 = arith.constant 0 : index
    %c0_34 = arith.constant 0 : index
    %74 = vector.load %arg11[%c0_32, %c0_33, %c0_34] : memref<1x1x128xf32, #tpu.memory_space<vmem>>, vector<1x1x128xf32>
    %75 = vector.shape_cast %74 : vector<1x1x128xf32> to vector<1x128xf32>
    %cst_35 = arith.constant dense<0.000000e+00> : vector<8xf32>
    %76 = vector.multi_reduction <add>, %71, %cst_35 [1] : vector<8x128xf32> to vector<8xf32>
    %77 = vector.shape_cast %76 : vector<8xf32> to vector<8x1xf32>
    %cst_36 = arith.constant 1.280000e+02 : f32
    %78 = vector.broadcast %cst_36 : f32 to vector<8x1xf32>
    %79 = arith.divf %77, %78 : vector<8x1xf32>
    %80 = vector.broadcast %79 : vector<8x1xf32> to vector<8x128xf32>
    %81 = arith.subf %71, %80 : vector<8x128xf32>
    %82 = arith.mulf %81, %81 : vector<8x128xf32>
    %cst_37 = arith.constant dense<0.000000e+00> : vector<8xf32>
    %83 = vector.multi_reduction <add>, %82, %cst_37 [1] : vector<8x128xf32> to vector<8xf32>
    %84 = vector.shape_cast %83 : vector<8xf32> to vector<8x1xf32>
    %cst_38 = arith.constant 1.280000e+02 : f32
    %85 = vector.broadcast %cst_38 : f32 to vector<8x1xf32>
    %86 = arith.divf %84, %85 : vector<8x1xf32>
    %87 = vector.broadcast %79 : vector<8x1xf32> to vector<8x128xf32>
    %88 = arith.subf %71, %87 : vector<8x128xf32>
    %cst_39 = arith.constant 9.99999974E-6 : f32
    %89 = vector.broadcast %cst_39 : f32 to vector<8x1xf32>
    %90 = arith.addf %86, %89 : vector<8x1xf32>
    %91 = math.rsqrt %90 : vector<8x1xf32>
    %92 = vector.broadcast %91 : vector<8x1xf32> to vector<8x128xf32>
    %93 = arith.mulf %88, %92 : vector<8x128xf32>
    %94 = vector.broadcast %73 : vector<1x128xf32> to vector<8x128xf32>
    %95 = arith.mulf %93, %94 : vector<8x128xf32>
    %96 = vector.broadcast %75 : vector<1x128xf32> to vector<8x128xf32>
    %97 = arith.addf %95, %96 : vector<8x128xf32>
    %98 = arith.truncf %97 : vector<8x128xf32> to vector<8x128xbf16>
    %c0_40 = arith.constant 0 : index
    %c0_41 = arith.constant 0 : index
    %c0_42 = arith.constant 0 : index
    %99 = vector.load %arg12[%c0_40, %c0_41, %c0_42] : memref<1x128x256xbf16, #tpu.memory_space<vmem>>, vector<1x128x256xbf16>
    %100 = vector.shape_cast %99 : vector<1x128x256xbf16> to vector<128x256xbf16>
    %cst_43 = arith.constant dense<0.000000e+00> : vector<8x256xf32>
    %101 = tpu.matmul %98, %100, %cst_43 {dimension_numbers = #tpu.dot_dimension_numbers<[1], [0], [0], [1], [0, 0, 1, 1], [], []>} : vector<8x128xbf16>, vector<128x256xbf16>, vector<8x256xf32> -> vector<8x256xf32>
    %c0_44 = arith.constant 0 : index
    %c0_45 = arith.constant 0 : index
    %c0_46 = arith.constant 0 : index
    %102 = vector.load %arg13[%c0_44, %c0_45, %c0_46] : memref<1x1x256xf32, #tpu.memory_space<vmem>>, vector<1x1x256xf32>
    %103 = vector.shape_cast %102 : vector<1x1x256xf32> to vector<1x256xf32>
    %104 = vector.broadcast %103 : vector<1x256xf32> to vector<8x256xf32>
    %105 = arith.addf %101, %104 : vector<8x256xf32>
    %cst_47 = arith.constant 5.000000e-01 : f32
    %106 = vector.broadcast %cst_47 : f32 to vector<8x256xf32>
    %107 = arith.mulf %106, %105 : vector<8x256xf32>
    %cst_48 = arith.constant 0.707106769 : f32
    %108 = vector.broadcast %cst_48 : f32 to vector<8x256xf32>
    %109 = arith.mulf %105, %108 : vector<8x256xf32>
    %110 = math.erf %109 : vector<8x256xf32>
    %cst_49 = arith.constant 1.000000e+00 : f32
    %111 = vector.broadcast %cst_49 : f32 to vector<8x256xf32>
    %112 = arith.addf %111, %110 : vector<8x256xf32>
    %113 = arith.mulf %107, %112 : vector<8x256xf32>
    %114 = arith.truncf %113 : vector<8x256xf32> to vector<8x256xbf16>
    %c0_50 = arith.constant 0 : index
    %c0_51 = arith.constant 0 : index
    %c0_52 = arith.constant 0 : index
    %115 = vector.load %arg14[%c0_50, %c0_51, %c0_52] : memref<1x256x128xbf16, #tpu.memory_space<vmem>>, vector<1x256x128xbf16>
    %116 = vector.shape_cast %115 : vector<1x256x128xbf16> to vector<256x128xbf16>
    %cst_53 = arith.constant dense<0.000000e+00> : vector<8x128xf32>
    %117 = tpu.matmul %114, %116, %cst_53 {dimension_numbers = #tpu.dot_dimension_numbers<[1], [0], [0], [1], [0, 0, 1, 1], [], []>} : vector<8x256xbf16>, vector<256x128xbf16>, vector<8x128xf32> -> vector<8x128xf32>
    %c0_54 = arith.constant 0 : index
    %c0_55 = arith.constant 0 : index
    %c0_56 = arith.constant 0 : index
    %118 = vector.load %arg15[%c0_54, %c0_55, %c0_56] : memref<1x1x128xf32, #tpu.memory_space<vmem>>, vector<1x1x128xf32>
    %119 = vector.shape_cast %118 : vector<1x1x128xf32> to vector<1x128xf32>
    %120 = vector.broadcast %119 : vector<1x128xf32> to vector<8x128xf32>
    %121 = arith.addf %117, %120 : vector<8x128xf32>
    %122 = arith.addf %121, %97 : vector<8x128xf32>
    %c0_57 = arith.constant 0 : index
    %c0_58 = arith.constant 0 : index
    %c0_59 = arith.constant 0 : index
    %123 = vector.load %arg16[%c0_57, %c0_58, %c0_59] : memref<1x1x128xf32, #tpu.memory_space<vmem>>, vector<1x1x128xf32>
    %124 = vector.shape_cast %123 : vector<1x1x128xf32> to vector<1x128xf32>
    %c0_60 = arith.constant 0 : index
    %c0_61 = arith.constant 0 : index
    %c0_62 = arith.constant 0 : index
    %125 = vector.load %arg17[%c0_60, %c0_61, %c0_62] : memref<1x1x128xf32, #tpu.memory_space<vmem>>, vector<1x1x128xf32>
    %126 = vector.shape_cast %125 : vector<1x1x128xf32> to vector<1x128xf32>
    %cst_63 = arith.constant dense<0.000000e+00> : vector<8xf32>
    %127 = vector.multi_reduction <add>, %122, %cst_63 [1] : vector<8x128xf32> to vector<8xf32>
    %128 = vector.shape_cast %127 : vector<8xf32> to vector<8x1xf32>
    %cst_64 = arith.constant 1.280000e+02 : f32
    %129 = vector.broadcast %cst_64 : f32 to vector<8x1xf32>
    %130 = arith.divf %128, %129 : vector<8x1xf32>
    %131 = vector.broadcast %130 : vector<8x1xf32> to vector<8x128xf32>
    %132 = arith.subf %122, %131 : vector<8x128xf32>
    %133 = arith.mulf %132, %132 : vector<8x128xf32>
    %cst_65 = arith.constant dense<0.000000e+00> : vector<8xf32>
    %134 = vector.multi_reduction <add>, %133, %cst_65 [1] : vector<8x128xf32> to vector<8xf32>
    %135 = vector.shape_cast %134 : vector<8xf32> to vector<8x1xf32>
    %cst_66 = arith.constant 1.280000e+02 : f32
    %136 = vector.broadcast %cst_66 : f32 to vector<8x1xf32>
    %137 = arith.divf %135, %136 : vector<8x1xf32>
    %138 = vector.broadcast %130 : vector<8x1xf32> to vector<8x128xf32>
    %139 = arith.subf %122, %138 : vector<8x128xf32>
    %cst_67 = arith.constant 9.99999974E-6 : f32
    %140 = vector.broadcast %cst_67 : f32 to vector<8x1xf32>
    %141 = arith.addf %137, %140 : vector<8x1xf32>
    %142 = math.rsqrt %141 : vector<8x1xf32>
    %143 = vector.broadcast %142 : vector<8x1xf32> to vector<8x128xf32>
    %144 = arith.mulf %139, %143 : vector<8x128xf32>
    %145 = vector.broadcast %124 : vector<1x128xf32> to vector<8x128xf32>
    %146 = arith.mulf %144, %145 : vector<8x128xf32>
    %147 = vector.broadcast %126 : vector<1x128xf32> to vector<8x128xf32>
    %148 = arith.addf %146, %147 : vector<8x128xf32>
    %c0_68 = arith.constant 0 : index
    %c0_69 = arith.constant 0 : index
    %149 = vector.load %arg23[%c0_68, %c0_69] : memref<8x128xf32, #tpu.memory_space<vmem>>, vector<8x128xf32>
    tpu.vector_store %arg23[%c0_68, %c0_69], %148 {strides = array<i32>} : memref<8x128xf32, #tpu.memory_space<vmem>>, vector<8x128xf32>,
    %c7_i32 = arith.constant 7 : i32
    %150 = arith.cmpi eq, %arg1, %c7_i32 : i32
    %151 = arith.extui %150 : i1 to i32
    %c0_i32_70 = arith.constant 0 : i32
    %152 = arith.cmpi ne, %151, %c0_i32_70 : i32
    scf.if %152 {
      %153 = vector.extract_strided_slice %148 {offsets = [0, 0], sizes = [1, 128], strides = [1, 1]} : vector<8x128xf32> to vector<1x128xf32>
      %154 = arith.truncf %153 : vector<1x128xf32> to vector<1x128xbf16>
      %c0_71 = arith.constant 0 : index
      %c0_72 = arith.constant 0 : index
      %155 = vector.load %arg18[%c0_71, %c0_72] : memref<128x128xbf16, #tpu.memory_space<vmem>>, vector<128x128xbf16>
      %cst_73 = arith.constant dense<0.000000e+00> : vector<1x128xf32>
      %156 = tpu.matmul %154, %155, %cst_73 {dimension_numbers = #tpu.dot_dimension_numbers<[1], [0], [0], [1], [0, 0, 1, 1], [], []>} : vector<1x128xbf16>, vector<128x128xbf16>, vector<1x128xf32> -> vector<1x128xf32>
      %c0_74 = arith.constant 0 : index
      %c0_75 = arith.constant 0 : index
      %157 = vector.load %arg19[%c0_74, %c0_75] : memref<1x128xf32, #tpu.memory_space<vmem>>, vector<1x128xf32>
      %158 = arith.addf %156, %157 : vector<1x128xf32>
      %159 = math.tanh %158 : vector<1x128xf32>
      %160 = arith.truncf %159 : vector<1x128xf32> to vector<1x128xbf16>
      %c0_76 = arith.constant 0 : index
      %c0_77 = arith.constant 0 : index
      %161 = vector.load %arg20[%c0_76, %c0_77] : memref<128x128xbf16, #tpu.memory_space<vmem>>, vector<128x128xbf16>
      %cst_78 = arith.constant dense<0.000000e+00> : vector<1x128xf32>
      %162 = tpu.matmul %160, %161, %cst_78 {dimension_numbers = #tpu.dot_dimension_numbers<[1], [0], [0], [1], [0, 0, 1, 1], [], []>} : vector<1x128xbf16>, vector<128x128xbf16>, vector<1x128xf32> -> vector<1x128xf32>
      %c0_79 = arith.constant 0 : index
      %c0_80 = arith.constant 0 : index
      %163 = vector.load %arg21[%c0_79, %c0_80] : memref<1x128xf32, #tpu.memory_space<vmem>>, vector<1x128xf32>
      %164 = arith.addf %162, %163 : vector<1x128xf32>
      %165 = vector.shape_cast %164 : vector<1x128xf32> to vector<1x1x128xf32>
      %c0_81 = arith.constant 0 : index
      %c0_82 = arith.constant 0 : index
      %c0_83 = arith.constant 0 : index
      %166 = vector.load %arg22[%c0_81, %c0_82, %c0_83] : memref<1x1x128xf32, #tpu.memory_space<vmem>>, vector<1x1x128xf32>
      tpu.vector_store %arg22[%c0_81, %c0_82, %c0_83], %165 {strides = array<i32>} : memref<1x1x128xf32, #tpu.memory_space<vmem>>, vector<1x1x128xf32>,
    } else {
    }
    return
  }
  func.func @transform_0(%arg0: i32, %arg1: i32) -> (i32, i32, i32) {
    %c0_i32 = arith.constant 0 : i32
    %c0_i32_0 = arith.constant 0 : i32
    %c0_i32_1 = arith.constant 0 : i32
    return %arg0, %c0_i32, %c0_i32_0 : i32, i32, i32
  }
  func.func @transform_1(%arg0: i32, %arg1: i32) -> (i32, i32, i32) {
    %c0_i32 = arith.constant 0 : i32
    %c0_i32_0 = arith.constant 0 : i32
    %c0_i32_1 = arith.constant 0 : i32
    return %arg0, %c0_i32, %c0_i32_0 : i32, i32, i32
  }
  func.func @transform_2(%arg0: i32, %arg1: i32) -> (i32, i32) {
    %c0_i32 = arith.constant 0 : i32
    %c0_i32_0 = arith.constant 0 : i32
    %c0_i32_1 = arith.constant 0 : i32
    return %c0_i32, %c0_i32_0 : i32, i32
  }
  func.func @transform_3(%arg0: i32, %arg1: i32) -> (i32, i32) {
    %c0_i32 = arith.constant 0 : i32
    %c0_i32_0 = arith.constant 0 : i32
    %c0_i32_1 = arith.constant 0 : i32
    return %c0_i32, %c0_i32_0 : i32, i32
  }
  func.func @transform_4(%arg0: i32, %arg1: i32) -> (i32, i32, i32) {
    %c0_i32 = arith.constant 0 : i32
    %c0_i32_0 = arith.constant 0 : i32
    %c0_i32_1 = arith.constant 0 : i32
    return %arg1, %c0_i32, %c0_i32_0 : i32, i32, i32
  }
  func.func @transform_5(%arg0: i32, %arg1: i32) -> (i32, i32, i32) {
    %c0_i32 = arith.constant 0 : i32
    %c0_i32_0 = arith.constant 0 : i32
    %c0_i32_1 = arith.constant 0 : i32
    return %arg1, %c0_i32, %c0_i32_0 : i32, i32, i32
  }
  func.func @transform_6(%arg0: i32, %arg1: i32) -> (i32, i32, i32) {
    %c0_i32 = arith.constant 0 : i32
    %c0_i32_0 = arith.constant 0 : i32
    %c0_i32_1 = arith.constant 0 : i32
    return %arg1, %c0_i32, %c0_i32_0 : i32, i32, i32
  }
  func.func @transform_7(%arg0: i32, %arg1: i32) -> (i32, i32, i32) {
    %c0_i32 = arith.constant 0 : i32
    %c0_i32_0 = arith.constant 0 : i32
    %c0_i32_1 = arith.constant 0 : i32
    return %arg1, %c0_i32, %c0_i32_0 : i32, i32, i32
  }
  func.func @transform_8(%arg0: i32, %arg1: i32) -> (i32, i32, i32) {
    %c0_i32 = arith.constant 0 : i32
    %c0_i32_0 = arith.constant 0 : i32
    %c0_i32_1 = arith.constant 0 : i32
    return %arg1, %c0_i32, %c0_i32_0 : i32, i32, i32
  }
  func.func @transform_9(%arg0: i32, %arg1: i32) -> (i32, i32, i32) {
    %c0_i32 = arith.constant 0 : i32
    %c0_i32_0 = arith.constant 0 : i32
    %c0_i32_1 = arith.constant 0 : i32
    return %arg1, %c0_i32, %c0_i32_0 : i32, i32, i32
  }
  func.func @transform_10(%arg0: i32, %arg1: i32) -> (i32, i32, i32) {
    %c0_i32 = arith.constant 0 : i32
    %c0_i32_0 = arith.constant 0 : i32
    %c0_i32_1 = arith.constant 0 : i32
    return %arg1, %c0_i32, %c0_i32_0 : i32, i32, i32
  }
  func.func @transform_11(%arg0: i32, %arg1: i32) -> (i32, i32, i32) {
    %c0_i32 = arith.constant 0 : i32
    %c0_i32_0 = arith.constant 0 : i32
    %c0_i32_1 = arith.constant 0 : i32
    return %arg1, %c0_i32, %c0_i32_0 : i32, i32, i32
  }
  func.func @transform_12(%arg0: i32, %arg1: i32) -> (i32, i32, i32) {
    %c0_i32 = arith.constant 0 : i32
    %c0_i32_0 = arith.constant 0 : i32
    %c0_i32_1 = arith.constant 0 : i32
    return %arg1, %c0_i32, %c0_i32_0 : i32, i32, i32
  }
  func.func @transform_13(%arg0: i32, %arg1: i32) -> (i32, i32, i32) {
    %c0_i32 = arith.constant 0 : i32
    %c0_i32_0 = arith.constant 0 : i32
    %c0_i32_1 = arith.constant 0 : i32
    return %arg1, %c0_i32, %c0_i32_0 : i32, i32, i32
  }
  func.func @transform_14(%arg0: i32, %arg1: i32) -> (i32, i32, i32) {
    %c0_i32 = arith.constant 0 : i32
    %c0_i32_0 = arith.constant 0 : i32
    %c0_i32_1 = arith.constant 0 : i32
    return %arg1, %c0_i32, %c0_i32_0 : i32, i32, i32
  }
  func.func @transform_15(%arg0: i32, %arg1: i32) -> (i32, i32, i32) {
    %c0_i32 = arith.constant 0 : i32
    %c0_i32_0 = arith.constant 0 : i32
    %c0_i32_1 = arith.constant 0 : i32
    return %arg1, %c0_i32, %c0_i32_0 : i32, i32, i32
  }
  func.func @transform_16(%arg0: i32, %arg1: i32) -> (i32, i32) {
    %c0_i32 = arith.constant 0 : i32
    %c0_i32_0 = arith.constant 0 : i32
    %c0_i32_1 = arith.constant 0 : i32
    return %c0_i32, %c0_i32_0 : i32, i32
  }
  func.func @transform_17(%arg0: i32, %arg1: i32) -> (i32, i32) {
    %c0_i32 = arith.constant 0 : i32
    %c0_i32_0 = arith.constant 0 : i32
    %c0_i32_1 = arith.constant 0 : i32
    return %c0_i32, %c0_i32_0 : i32, i32
  }
  func.func @transform_18(%arg0: i32, %arg1: i32) -> (i32, i32) {
    %c0_i32 = arith.constant 0 : i32
    %c0_i32_0 = arith.constant 0 : i32
    %c0_i32_1 = arith.constant 0 : i32
    return %c0_i32, %c0_i32_0 : i32, i32
  }
  func.func @transform_19(%arg0: i32, %arg1: i32) -> (i32, i32) {
    %c0_i32 = arith.constant 0 : i32
    %c0_i32_0 = arith.constant 0 : i32
    %c0_i32_1 = arith.constant 0 : i32
    return %c0_i32, %c0_i32_0 : i32, i32
  }
  func.func @transform_20(%arg0: i32, %arg1: i32) -> (i32, i32, i32) {
    %c0_i32 = arith.constant 0 : i32
    %c0_i32_0 = arith.constant 0 : i32
    %c0_i32_1 = arith.constant 0 : i32
    return %arg0, %c0_i32, %c0_i32_0 : i32, i32, i32
  }
}

</mosaic_0001>

<bundles_post_ra>
// kernel: roberta_forward.1
= control target key start
LH: loop header
LB: loop body
LE: loop exit
PB: predicated region body
PF: predicated region fallthrough
CT: control target
= control target key end

     0   :  { %s4424_s0 = inlined_call_operand.vmem [shape: f32[2,8,128], index: 0, kind: input, shape index: {}]   ;;  %s4425_s1 = inlined_call_operand.vmem [shape: f32[2,1,8], index: 1, kind: input, shape index: {}]   ;;  %s4426_s2 = inlined_call_operand.vmem [shape: f32[1,128], index: 2, kind: input, shape index: {}]   ;;  %s4427_s3 = inlined_call_operand.vmem [shape: f32[1,128], index: 3, kind: input, shape index: {}]   ;;  %s4428_s4 = inlined_call_operand.hbm [shape: bf16[8,128,384], index: 4, kind: input, shape index: {}]   ;;  %s4429_s5 = inlined_call_operand.vmem [shape: f32[8,1,384], index: 5, kind: input, shape index: {}]   ;;  %s4430_s6 = inlined_call_operand.hbm [shape: bf16[8,128,128], index: 6, kind: input, shape index: {}]   ;;  %s4431_s7 = inlined_call_operand.vmem [shape: f32[8,1,128], index: 7, kind: input, shape index: {}]   ;;  %s4432_s8 = inlined_call_operand.vmem [shape: f32[8,1,128], index: 8, kind: input, shape index: {}]   ;;  %s4433_s9 = inlined_call_operand.vmem [shape: f32[8,1,128], index: 9, kind: input, shape index: {}]   ;;  %s4434_s10 = inlined_call_operand.hbm [shape: bf16[8,128,256], index: 10, kind: input, shape index: {}]   ;;  %s4435_s11 = inlined_call_operand.vmem [shape: f32[8,1,256], index: 11, kind: input, shape index: {}]   ;;  %s4436_s12 = inlined_call_operand.hbm [shape: bf16[8,256,128], index: 12, kind: input, shape index: {}]   ;;  %s4437_s13 = inlined_call_operand.vmem [shape: f32[8,1,128], index: 13, kind: input, shape index: {}]   ;;  %s4438_s14 = inlined_call_operand.vmem [shape: f32[8,1,128], index: 14, kind: input, shape index: {}]   ;;  %s4439_s15 = inlined_call_operand.vmem [shape: f32[8,1,128], index: 15, kind: input, shape index: {}]   ;;  %s4440_s16 = inlined_call_operand.vmem [shape: bf16[128,128], index: 16, kind: input, shape index: {}]   ;;  %s4441_s17 = inlined_call_operand.vmem [shape: f32[1,128], index: 17, kind: input, shape index: {}]   ;;  %s4442_s18 = inlined_call_operand.vmem [shape: bf16[128,128], index: 18, kind: input, shape index: {}]   ;;  %s4443_s19 = inlined_call_operand.vmem [shape: f32[1,128], index: 19, kind: input, shape index: {}]   ;;  %s4444_s20 = inlined_call_operand.hbm [shape: f32[2,1,128], index: 20, kind: output, shape index: {}]  }
   0x1   :  { %4465 = sst [smem:[#allocation31_spill]] %s4424_s0 }
   0x2   :  { %4466 = sst [smem:[#allocation32_spill]] %s4425_s1 }
   0x3   :  { %4467 = sst [smem:[#allocation33_spill]] %s4426_s2 }
   0x4   :  { %4468 = sst [smem:[#allocation34_spill]] %s4427_s3 }
   0x5   :  { %4469 = sst [smem:[#allocation35_spill]] %s4428_s4 }
   0x6   :  { %4470 = sst [smem:[#allocation36_spill]] %s4429_s5 }
   0x7   :  { %4471 = sst [smem:[#allocation37_spill]] %s4430_s6 }
   0x8   :  { %4472 = sst [smem:[#allocation38_spill]] %s4432_s8 }
   0x9   :  { %4473 = sst [smem:[#allocation39_spill]] %s4433_s9 }
   0xa   :  { %4474 = sst [smem:[#allocation40_spill]] %s4434_s10 }
   0xb   :  { %4475 = sst [smem:[#allocation41_spill]] %s4435_s11 }
   0xc   :  { %4476 = sst [smem:[#allocation42_spill]] %s4436_s12 }
   0xd   :  { %4477 = sst [smem:[#allocation43_spill]] %s4437_s13 }
   0xe   :  { %4478 = sst [smem:[#allocation44_spill]] %s4438_s14 }
   0xf   :  { %4479 = sst [smem:[#allocation45_spill]] %s4439_s15 }
  0x10   :  { %4480 = sst [smem:[#allocation46_spill]] %s4440_s16 }
  0x11   :  { %4481 = sst [smem:[#allocation47_spill]] %s4441_s17 }
  0x12   :  { %4482 = sst [smem:[#allocation48_spill]] %s4442_s18 }
  0x13   :  { %4483 = sst [smem:[#allocation49_spill]] %s4443_s19 }
  0x14   :  { %4484 = sst [smem:[#allocation50_spill]] %s4444_s20 }
  0x15   :  { %25 = vsyncpa [#allocation4], 0 }
  0x16   :  { %27 = vsyncpa [#allocation4 + $0x1], 0 }
  0x17   :  { %28 = vsyncpa [#allocation7], 0 }
  0x18   :  { %30 = vsyncpa [#allocation7 + $0x1], 0 }
  0x19   :  { %31 = vsyncpa [#allocation10], 0 }
  0x1a   :  { %33 = vsyncpa [#allocation10 + $0x1], 0 }
  0x1b   :  { %34 = vsyncpa [#allocation5], 0 }
  0x1c   :  { %36 = vsyncpa [#allocation5 + $0x1], 0  ;;  %s3838_s1 = smov 0   ;;  %s3840_s22 = smov 0  }
  0x1d   :  { %s3842_s23 = smov 0   ;;  %s3844_s24 = smov 0  }
  0x1e   :  { %s3846_s2 = smov 0   ;;  %s3848_s25 = smov 0  }
  0x1f   :  { %s3850_s3 = smov 0   ;;  %s3852_s26 = smov 0  }
  0x20   :  { %s3854_s27 = smov 0   ;;  %s3856_s28 = smov 0  }
  0x21   :  { %s3858_s4 = smov 0  }
  0x22 LB: > { %4485 = sst [smem:[#allocation16_spill]] %s3672_s1  ;;  %s3892_s29 = sadd.s32 4294967295, %s3712_s4   ;;  %s3712_s4 = sphi %s3858_s4, %s42_s4   ;;  %s3708_s28 = sphi %s3856_s28, %s4555_s28   ;;  %s3704_s27 = sphi %s3854_s27, %s4554_s27   ;;  %s3700_s26 = sphi %s3852_s26, %s4553_s26   ;;  %s3696_s3 = sphi %s3850_s3, %s4552_s3   ;;  %s3692_s25 = sphi %s3848_s25, %s4551_s25   ;;  %s3688_s2 = sphi %s3846_s2, %s4550_s2   ;;  %s3684_s24 = sphi %s3844_s24, %s4549_s24   ;;  %s3680_s23 = sphi %s3842_s23, %s4548_s23   ;;  %s3676_s22 = sphi %s3840_s22, %s4557_s22   ;;  %s3672_s1 = sphi %s3838_s1, %s4556_s1  }
  0x23   : > { %4486 = sst [smem:[#allocation17_spill]] %s3680_s23  ;;  %s2891_s30 = sadd.s32 4294967294, %s3712_s4  }
  0x24   : > { %4487 = sst [smem:[#allocation18_spill]] %s3688_s2  ;;  %s51_s0 = sadd.s32 1, %s3704_s27 }
  0x25   : > { %4488 = sst [smem:[#allocation19_spill]] %s3692_s25  ;;  %s54_s21 = sadd.s32 1, %s3708_s28 }
  0x26   : > { %4489 = sst [smem:[#allocation20_spill]] %s3700_s26  ;;  %p52_p0 = scmp.ge.s32.totalorder %s51_s0, 8 }
  0x27   : > { %4490 = sst [smem:[#allocation21_spill]] %s3704_s27  ;;  %s155_s20 = sadd.s32 1, %s3692_s25 }
  0x28   : > { %4491 = sst [smem:[#allocation22_spill]] %s3708_s28  ;;  %p162_p1 = scmp.ne.s32.totalorder %s3692_s25, %s3688_s2 }
  0x29   : > { %4492 = sst [smem:[#allocation23_spill]] %s3712_s4  ;;  %p163_p2 = scmp.eq.s32.totalorder %s3712_s4, 0 }
  0x2a   : > { %s4559_s0 = smov (%p52_p0, %s51_s0), 0  ;;  %s4561_s21 = smov (!%p52_p0, %s54_s21), %s3708_s28 }
  0x2b   : > { %4493 = sst [smem:[#allocation24_spill]] %s4559_s0  ;;  %s152_s19 = ssub.s32 %s3704_s27, %s4559_s0 }
  0x2c   : > { %p3906_p3 = por %p163_p2, %p162_p1  ;;  %p56_p4 = scmp.ge.s32.totalorder %s4561_s21, 2 }
  0x2d   : > { %p153_p5 = scmp.eq.s32.totalorder %s152_s19, 0  ;;  %p168_p6 = scmp.ne.s32.totalorder %s3688_s2, %s3684_s24 }
  0x2e   : > { %p169_p7 = scmp.eq.s32.totalorder %s3892_s29, 0  ;;  %s4563_s21 = smov (%p56_p4, %s4561_s21), 0 }
  0x2f   : > { %4495 = sst [smem:[#allocation25_spill]] %s4563_s21  ;;  %s548_s16 = ssub.s32 %s3708_s28, %s4563_s21 }
  0x30   : > { %s3915_s18 = scalar_select %p153_p5, %s3692_s25, %s155_s20  }
  0x31   : > { %p3917_p8 = por %p169_p7, %p168_p6  ;;  %p549_p9 = scmp.eq.s32.totalorder %s548_s16, 0 }
  0x32   : > { %4496 = sst [smem:[#allocation26_spill]] %s3915_s18  ;;  %s551_s15 = sadd.s32 1, %s3680_s23 }
  0x33   : > { %p561_p10 = scmp.ne.s32.totalorder %s3680_s23, %s3676_s22  ;;  %p562_p11 = scmp.eq.s32.totalorder %s3892_s29, 15 }
  0x34   : > { %s3928_s19 = scalar_select %p549_p9, %s3680_s23, %s551_s15  }
  0x35   : > { %p3930_p12 = por %p562_p11, %p561_p10  ;;  %p567_p13 = scmp.ne.s32.totalorder %s3676_s22, %s3672_s1 }
  0x36   : > { %4498 = sst [smem:[#allocation27_spill]] %s3928_s19  ;;  %p568_p0 = scmp.eq.s32.totalorder %s2891_s30, 15 }
  0x37   : > { %s4499_s24 = scalar_select %p3930_p12, 1, 0 }
  0x38   : > { %p3244_p1 = scmp.lt.s32.totalorder %s3712_s4, 16  ;;  %s3938_s20 = sand.u32 1, %s3692_s25  }
  0x39   : > { %4500 = sst [smem:[#allocation28_spill]] %s4499_s24  ;;  %p3940_p2 = por %p568_p0, %p567_p13 }
  0x3a   : > { %s647_s16 = sand.u32 1, %s3712_s4   ;;  %p3947_p4 = pnand %p3244_p1, %p3906_p3 }
  0x3b   : > { %s4501_s18 = scalar_select %p3940_p2, 1, 0 }
  0x3c   : > { %s2895_s15 = sshll.u32 %s3938_s20, 6  ;;  %s3016_s28 = sshll.u32 %s3704_s27, 10 }
  0x3d   : > { %4502 = sst [smem:[#allocation29_spill]] %s4501_s18  ;;  %s651_s23 = scalar_lea.vmem [#allocation6], %s2895_s15 }
  0x3e   : > { %s4504_s6 = sld [smem:[#allocation37_spill]]  ;;  %s658_s1 = sshll.u32 %s651_s23, 4  ;;  %s659_s1 = int_to_ptr.vmem [resolvable:$true] %s658_s1 }
  0x3f   : > { %p2904_p5 = scmp.ge.s32.totalorder %s3712_s4, 1  ;;  %s3957_s24 = scalar_lea.sflag [#allocation7], %s647_s16 }
  0x40   : > { %p3474_p6 = pneg %p3947_p4  ;;  %s3485_s17 = scalar_lea.vmem %s659_s1, 1024 }
  0x41   : > { %p3486_p3 = scmp.ne.s32.totalorder %s659_s1, %s3485_s17  ;;  %s3714_s18 = smov [#allocation6]  }
  0x42   : > { %s3490_s14 = sshll.u32 %s3714_s18, 4  ;;  %s3491_s14 = int_to_ptr.vmem [resolvable:$false] %s3490_s14 }
  0x43   : > { %p3488_p7 = pnand %p3486_p3, %p3474_p6  ;;  %s3492_s11 = scalar_lea.vmem %s3491_s14, 2048 }
  0x44   : > { %s657_s25 = scalar_lea.hbm %s4504_s6, %s3016_s28  ;;  %p3493_p10 = scmp.lt.s32.totalorder %s659_s1, %s3491_s14 }
  0x45   : > { %p3489_p9 = pneg %p3488_p7  ;;  %p3494_p11 = scmp.lt.s32.totalorder %s3492_s11, %s3485_s17 }
  0x47   : > { %p3495_p13 = por %p3494_p11, %p3493_p10 }
  0x49   : > { %p3496_p0 = pnand %p3495_p13, %p3489_p9 }
  0x4b   : > { %3499 = shalt.err (!%p3496_p0)
}
  0x4c   : > { %s4457_s23 = smov 64   ;;  %s4458_s28 = smov 4  }
  0x4d   : > { %3233 = dma.hbm_to_vmem [thread:$0]  (!%p3947_p4), %s657_s25, 1024, %s659_s1, %s3957_s24, %s4457_s23, %s4457_s23, %s4458_s28  }
  0x4e   : > { %p751_p1 = scmp.lt.s32.totalorder %s3712_s4, 17  ;;  %s3213_s14 = smul.u32 192, %s3938_s20 }
  0x4f   : > { %s3214_s18 = smul.u32 3072, %s3704_s27  ;;  %s4506_s15 = sld [smem:[#allocation35_spill]] }
  0x50   : > { %p3973_p3 = pnand %p2904_p5, %p751_p1  ;;  %s623_s17 = scalar_lea.vmem [#allocation3], %s3213_s14 }
  0x51   : > { %s630_s6 = sshll.u32 %s623_s17, 4  ;;  %s2898_s13 = sshll.u32 %s3938_s20, 7  ;;  %s631_s6 = int_to_ptr.vmem [resolvable:$true] %s630_s6 }
  0x52   : > { %s620_s9 = scalar_lea.sflag [#allocation4], %s3938_s20  ;;  %s3513_s5 = scalar_lea.vmem %s631_s6, 3072 }
  0x53   : > { %p3514_p7 = scmp.ne.s32.totalorder %s631_s6, %s3513_s5  ;;  %s3717_s1 = smov [#allocation3]  }
  0x54   : > { %s3518_s25 = sshll.u32 %s3717_s1, 4  ;;  %s3519_s25 = int_to_ptr.vmem [resolvable:$false] %s3518_s25 }
  0x55   : > { %s629_s30 = scalar_lea.hbm %s4506_s15, %s3214_s18  ;;  %p3516_p9 = pnand %p3514_p7, %p3474_p6 }
  0x56   : > { %s3520_s23 = scalar_lea.vmem %s3519_s25, 6144  ;;  %p3521_p10 = scmp.lt.s32.totalorder %s631_s6, %s3519_s25 }
  0x57   : > { %p3517_p5 = pneg %p3516_p9  ;;  %p3522_p11 = scmp.lt.s32.totalorder %s3520_s23, %s3513_s5 }
  0x59   : > { %p3523_p13 = por %p3522_p11, %p3521_p10 }
  0x5b   : > { %p3524_p0 = pnand %p3523_p13, %p3517_p5 }
  0x5d   : > { %3527 = shalt.err (!%p3524_p0)
}
  0x5e   : > { %s3718_s14 = smov 192   ;;  %s3719_s18 = smov 12  }
  0x5f   : > { %3230 = dma.hbm_to_vmem [thread:$0]  (!%p3947_p4), %s629_s30, 3072, %s631_s6, %s620_s9, %s3718_s14, %s3718_s14, %s3719_s18  }
  0x60   : > { %s3017_s19 = sshll.u32 %s3704_s27, 11  ;;  %s4507_s10 = sld [smem:[#allocation40_spill]] }
  0x61   : > { %s690_s1 = scalar_lea.vmem [#allocation8], %s2898_s13  ;;  %s3720_s23 = smov [#allocation8]  }
  0x62   : > { %s697_s25 = sshll.u32 %s690_s1, 4  ;;  %s3546_s28 = sshll.u32 %s3720_s23, 4  ;;  %s698_s25 = int_to_ptr.vmem [resolvable:$true] %s697_s25  ;;  %s3547_s28 = int_to_ptr.vmem [resolvable:$false] %s3546_s28 }
  0x63   : > { %s3541_s5 = scalar_lea.vmem %s698_s25, 2048  ;;  %s3548_s4 = scalar_lea.vmem %s3547_s28, 4096 }
  0x64   : > { %p3542_p1 = scmp.ne.s32.totalorder %s698_s25, %s3541_s5  ;;  %p3549_p5 = scmp.lt.s32.totalorder %s698_s25, %s3547_s28 }
  0x65   : > { %p3550_p10 = scmp.lt.s32.totalorder %s3548_s4, %s3541_s5 }
  0x66   : > { %s696_s17 = scalar_lea.hbm %s4507_s10, %s3017_s19  ;;  %p3544_p7 = pnand %p3542_p1, %p3474_p6 }
  0x67   : > { %p3551_p11 = por %p3550_p10, %p3549_p5 }
  0x68   : > { %p3545_p9 = pneg %p3544_p7 }
  0x6a   : > { %p3552_p13 = pnand %p3551_p11, %p3545_p9 }
  0x6c   : > { %3555 = shalt.err (!%p3552_p13)
}
  0x6d   : > { %s3721_s6 = smov 128   ;;  %s3722_s9 = smov 8  }
  0x6e   : > { %3236 = dma.hbm_to_vmem [thread:$0]  (!%p3947_p4), %s696_s17, 2048, %s698_s25, %s3957_s24, %s3721_s6, %s3721_s6, %s3722_s9  }
  0x6f   : > { %s4508_s12 = sld [smem:[#allocation42_spill]]  ;;  %s718_s16 = scalar_lea.vmem [#allocation9], %s2898_s13 }
  0x70   : > { %s725_s28 = sshll.u32 %s718_s16, 4  ;;  %s715_s4 = scalar_lea.sflag [#allocation10], %s3938_s20  ;;  %s726_s28 = int_to_ptr.vmem [resolvable:$true] %s725_s28 }
  0x71   : > { %s3569_s15 = scalar_lea.vmem %s726_s28, 2048  ;;  %s3723_s1 = smov [#allocation9]  }
  0x72   : > { %p3570_p0 = scmp.ne.s32.totalorder %s726_s28, %s3569_s15  ;;  %s3574_s5 = sshll.u32 %s3723_s1, 4  ;;  %s3575_s5 = int_to_ptr.vmem [resolvable:$false] %s3574_s5 }
  0x73   : > { %s3576_s23 = scalar_lea.vmem %s3575_s5, 4096  ;;  %p3577_p9 = scmp.lt.s32.totalorder %s726_s28, %s3575_s5 }
  0x74   : > { %p3572_p1 = pnand %p3570_p0, %p3474_p6  ;;  %p3578_p5 = scmp.lt.s32.totalorder %s3576_s23, %s3569_s15 }
  0x75   : > { %s724_s18 = scalar_lea.hbm %s4508_s12, %s3017_s19 }
  0x76   : > { %p3573_p7 = pneg %p3572_p1  ;;  %p3579_p10 = por %p3578_p5, %p3577_p9 }
  0x78   : > { %p3580_p11 = pnand %p3579_p10, %p3573_p7 }
  0x7a   : > { %3583 = shalt.err (!%p3580_p11)
}
  0x7b   : > { %s4509_s13 = smov 4   ;;  %s4510_s24 = smov 64  }
  0x7c   : > { %3239 = dma.hbm_to_vmem [thread:$0]  (!%p3947_p4), %s724_s18, 2048, %s726_s28, %s715_s4, %s4510_s24, %s4510_s24, %s4509_s13  }
  0x7d   : > { %755 = sbr.rel (%p3973_p3) target bundleno = 3348 (0xd14), region = 100 }
  0x82   : > { %s757_s20 = sand.u32 1, %s3688_s2  }
  0x83   : > { %s3215_s19 = smul.u32 192, %s757_s20  ;;  %s758_s17 = scalar_lea.sflag [#allocation4], %s757_s20 }
  0x85   : > { %s4018_s25 = scalar_lea.vmem [#allocation3], %s3215_s19 }
  0x86   : > { %3655 = dma.done.wait (%p3917_p8), %s758_s17, 3072  }
  0x87   : > { %3657 = vsyncadd (%p3917_p8), %s758_s17, 4294964224  ;;  %s766_s21 = sand.u32 1, %s3892_s29   ;;  %s2905_s6 = sshll.u32 %s757_s20, 6 }
  0x88   : > { %s767_s9 = scalar_lea.sflag [#allocation7], %s766_s21  ;;  %s4025_s30 = scalar_lea.vmem [#allocation6], %s2905_s6 }
  0x89   : > { %3659 = dma.done.wait (%p3917_p8), %s767_s9, 3072  }
  0x8a   : > { %3661 = vsyncadd (%p3917_p8), %s767_s9, 4294964224  ;;  %s2906_s11 = sshll.u32 %s757_s20, 7  ;;  %s785_s18 = scalar_lea.sflag [#allocation10], %s757_s20 }
  0x8b   : > { %s4031_s14 = scalar_lea.vmem [#allocation8], %s2906_s11  ;;  %s4033_s16 = scalar_lea.vmem [#allocation9], %s2906_s11 }
  0x8c   : > { %4511 = sst [smem:[#allocation30_spill]] %s4033_s16 }
  0x8d   : > { %3663 = dma.done.wait (%p3917_p8), %s785_s18, 2048  }
  0x8e   : > { %3665 = vsyncadd (%p3917_p8), %s785_s18, 4294965248  ;;  %p892_p4 = scmp.lt.s32.totalorder %s3700_s26, 1  ;;  %p899_p6 = scmp.lt.s32.totalorder %s3696_s3, 7 }
  0x8f   : > { %s4513_s20 = sld [smem:[#allocation31_spill]]  ;;  %s4521_s15 = sand.u32 1, %s3676_s22  }
  0x90   : > { %s4043_s28 = scalar_select %p892_p4, %s3700_s26, 1 }
  0x91   : > { %s4046_s4 = scalar_select %p899_p6, %s3696_s3, 7 }
  0x92   : > { %s2908_s0 = sshll.u32 %s4043_s28, 3  ;;  %s4515_s27 = sld [smem:[#allocation36_spill]] }
  0x93   : > { %s3216_s17 = smul.u32 3, %s4046_s4  ;;  %s4516_s5 = sld [smem:[#allocation39_spill]] }
  0x94   : > { %s2909_s13 = sshll.u32 %s4046_s4, 1  ;;  %s4518_s9 = sld [smem:[#allocation41_spill]] }
  0x95   : > { %s895_s19 = scalar_lea.vmem %s4513_s20, %s2908_s0  ;;  %s4517_s20 = sld [smem:[#allocation43_spill]] }
  0x96   : > { %s4519_s29 = sld [smem:[#allocation44_spill]]  ;;  %s4094_s1 = scalar_lea.vmem [#allocation11], %s4521_s15 }
  0x97   : > { %p2910_p8 = scmp.ne.s32.totalorder %s3696_s3, 0 }
  0x98   : > { %s4068_s2 = scalar_lea.vmem %s4515_s27, %s3216_s17  ;;  %s4520_s17 = sld [smem:[#allocation45_spill]] }
  0x99   : > { %s911_s23 = scalar_lea.vmem %s4516_s5, %s4046_s4  ;;  %s4522_s5 = sld [smem:[#allocation33_spill]] (!%p2910_p8) }
  0x9a   : > { %s4082_s16 = scalar_lea.vmem %s4518_s9, %s2909_s13  ;;  %929 = sbr.rel (%p2910_p8) target bundleno = 467 (0x1d3), region = 120 }
  0x9b   : > { %s918_s26 = scalar_lea.vmem %s4517_s20, %s4046_s4  ;;  %s4523_s24 = sld [smem:[#allocation34_spill]] (!%p2910_p8) }
  0x9c   : > { %s921_s10 = scalar_lea.vmem %s4519_s29, %s4046_s4 }
  0x9e   : > { %s924_s8 = scalar_lea.vmem %s4520_s17, %s4046_s4 }
  0x9f   : > { %v930_v0 = vld [vmem:[%s895_s19] sm:$0xff] }
  0xa0   : > { %933 = vadd.xlane.f32.xlu0 %v930_v0  ;;  %v2911_v9 = vld [vmem:[%s4522_s5] ss:$0 sm:$0xff] }
  0xa1   : > { %v2912_v11 = vld [vmem:[%s4523_s24] ss:$0 sm:$0xff] }
 0x129   : > { %v934_v1 = vpop.xlane.xlu0 %933 }
 0x12a   : > { %v936_v2 = vmul.f32 0.0078125, %v934_v1 }
 0x12c   : > { %v937_v3 = vsub.f32 %v930_v0, %v936_v2 }
 0x12e   : > { %v938_v4 = vmul.f32 %v937_v3, %v937_v3 }
 0x130   : > { %939 = vadd.xlane.f32.xlu0 %v938_v4 }
 0x1b9   : > { %v940_v5 = vpop.xlane.xlu0 %939 }
 0x1ba   : > { %v941_v6 = vmul.f32 0.0078125, %v940_v5 }
 0x1bc   : > { %v942_v7 = vadd.f32 1e-05, %v941_v6 }
 0x1be   : > { %3348 = vrsqrt.f32 %v942_v7 }
 0x1cb   : > { %v3349_v8 = vpop.eup %3348 }
 0x1cc   : > { %v944_v10 = vmul.f32 %v3349_v8, %v937_v3 }
 0x1ce   : > { %v951_v12 = vmul.f32 %v2911_v9, %v944_v10 }
 0x1d0   : > { %v958_v13 = vadd.f32 %v2912_v11, %v951_v12 }
 0x1d2   : > { %959 = vst [vmem:[#allocation2] sm:$0xff] %v958_v13 }
 0x1d3 PF: > { %v3350_v14 = vld [vmem:[%s4018_s25 + $0xac] ss:$12 sps:$4 sm:$0xff]   ;;  %v3352_v15 = vld [vmem:[%s4018_s25 + $0xa8] ss:$12 sps:$4 sm:$0xff]   ;;  %v3724_v16 = vmov 0   ;;  %v3725_v17 = vmov 0.0   ;;  %v996_v42 = vlaneseq  ;;  %s4526_s18 = scalar_lea.vmem %s4431_s7, %s4046_s4 }
 0x1d4   : > { %1171 = vmatprep.mubr.bf16.mxu0 %v3724_v16  ;;  %3093 = vmatprep.subr.bf16.mxu1 %v3725_v17  ;;  %v3353_v18 = vld [vmem:[%s4018_s25 + $0x94] ss:$12 sps:$4 sm:$0xff]   ;;  %vm3726_vm0 = vmmov 0   ;;  %v3355_v19 = vld [vmem:[%s4018_s25 + $0x90] ss:$12 sps:$4 sm:$0xff]   ;;  %vm1221_vm1 = vcmask 261120  }
 0x1d5   : > { %1139 = vmatprep.subr.bf16.mxu0 %v3350_v14  ;;  %3109 = vmatprep.mubr.msk.bf16.mxu1 %vm3726_vm0, %v3725_v17  ;;  %v3356_v20 = vld [vmem:[%s4018_s25 + $0x7c] ss:$12 sps:$4 sm:$0xff]   ;;  %v3358_v21 = vld [vmem:[%s4018_s25 + $0x78] ss:$12 sps:$4 sm:$0xff]   ;;  %v3361_v23 = vld [vmem:[%s4018_s25 + $0x60] ss:$12 sps:$4 sm:$0xff]  }
 0x1d6   : > { %1140 = vmatpush1.bf16.msra.mxu0 %v3352_v15  ;;  %v3359_v22 = vld [vmem:[%s4018_s25 + $0x64] ss:$12 sps:$4 sm:$0xff]   ;;  %v3362_v25 = vld [vmem:[%s4018_s25 + $0x4c] ss:$12 sps:$4 sm:$0xff]   ;;  %v3364_v27 = vld [vmem:[%s4018_s25 + $0x48] ss:$12 sps:$4 sm:$0xff]  }
 0x1d7   : > { %1141 = vmatprep.subr.bf16.mxu0 %v3353_v18  ;;  %v3374_v24 = vld [vmem:[%s4018_s25 + $0xb0] ss:$12 sps:$4 sm:$0xff]   ;;  %v3375_v26 = vld [vmem:[%s4018_s25 + $0x98] ss:$12 sps:$4 sm:$0xff]   ;;  %v3365_v28 = vld [vmem:[%s4018_s25 + $0x34] ss:$12 sps:$4 sm:$0xff]  }
 0x1d8   : > { %3094 = vmatpush3.bf16.msra.mxu1 %v3374_v24  ;;  %v3367_v29 = vld [vmem:[%s4018_s25 + $0x30] ss:$12 sps:$4 sm:$0xff]   ;;  %v3376_v30 = vld [vmem:[%s4018_s25 + $0x80] ss:$12 sps:$4 sm:$0xff]   ;;  %v3377_v32 = vld [vmem:[%s4018_s25 + $0x68] ss:$12 sps:$4 sm:$0xff]  }
 0x1d9   : > { %3095 = vmatprep.subr.bf16.mxu1 %v3725_v17  ;;  %v3368_v31 = vld [vmem:[%s4018_s25 + $0x1c] ss:$12 sps:$4 sm:$0xff]   ;;  %v3370_v33 = vld [vmem:[%s4018_s25 + $0x18] ss:$12 sps:$4 sm:$0xff]   ;;  %v3373_v36 = vld [vmem:[%s4018_s25] ss:$12 sps:$4 sm:$0xff]  }
 0x1da   : > { %1142 = vmatpush1.bf16.msra.mxu0 %v3355_v19  ;;  %v3371_v34 = vld [vmem:[%s4018_s25 + $0x4] ss:$12 sps:$4 sm:$0xff]   ;;  %v4131_v37 = vld [vmem:[#allocation2] sm:$0xff]  ;;  %v3380_v40 = vld [vmem:[%s4018_s25 + $0x20] ss:$12 sps:$4 sm:$0xff]   ;;  %v4148_v43 = vshrl.u32 %v996_v42, 7 }
 0x1db   : > { %1143 = vmatprep.subr.bf16.mxu0 %v3356_v20  ;;  %v3378_v35 = vld [vmem:[%s4018_s25 + $0x50] ss:$12 sps:$4 sm:$0xff]   ;;  %v3379_v38 = vld [vmem:[%s4018_s25 + $0x38] ss:$12 sps:$4 sm:$0xff]   ;;  %v961_v39 = vpack.c.bf16 %v4131_v37, %v4131_v37  ;;  %v3381_v41 = vld [vmem:[%s4018_s25 + $0x8] ss:$12 sps:$4 sm:$0xff]  }
 0x1dc   : > { %3096 = vmatpush3.bf16.msra.mxu1 %v3375_v26  ;;  %v1002_v44 = vsub.s32 1, %v4148_v43  ;;  %v994_v45 = vld [vmem:[%s4068_s2] sm:$0x7]  ;;  %v998_v46 = vsub.s32 0, %v4148_v43  ;;  %s3727_s25 = smov 64   ;;  %s3728_s19 = smov 96  }
 0x1dd   : > { %3097 = vmatprep.subr.bf16.mxu1 %v3725_v17  ;;  %s3729_s2 = smov 32   ;;  %v1006_v61 = vsub.s32 2, %v4148_v43  ;;  %s4524_s6 = sld [smem:[#allocation32_spill]]  ;;  %vm1546_vm2 = vcmask 64512   ;;  %vm1906_vm3 = vcmask 523264   ;;  %vm1908_vm4 = vcmask 785408  }
 0x1de   : > { %1144 = vmatpush1.bf16.msra.mxu0 %v3358_v21  ;;  %v1003_v47 = vrot.slane %v994_v45, %v1002_v44  ;;  %v999_v50 = vrot.slane %v994_v45, %v998_v46  ;;  %s4527_s12 = sld [smem:[#allocation30_spill]]  ;;  %p2996_p3 = scmp.ne.s32.totalorder %s3696_s3, 7 }
 0x1df   : > { %1145 = vmatprep.subr.bf16.mxu0 %v3359_v22  ;;  %v1007_v0 = vrot.slane %v994_v45, %v1006_v61  ;;  %s4528_s15 = sld [smem:[#allocation38_spill]] }
 0x1e0   : > { %3098 = vmatpush3.bf16.msra.mxu1 %v3376_v30 }
 0x1e1   : > { %3099 = vmatprep.subr.bf16.mxu1 %v3725_v17 }
 0x1e2   : > { %1146 = vmatpush1.bf16.msra.mxu0 %v3361_v23 }
 0x1e3   : > { %1147 = vmatprep.subr.bf16.mxu0 %v3362_v25  ;;  %s4525_s11 = scalar_lea.vmem %s4524_s6, %s4043_s28  ;;  %s4534_s6 = sld [smem:[#allocation46_spill]] (!%p2996_p3) }
 0x1e4   : > { %3100 = vmatpush3.bf16.msra.mxu1 %v3377_v32  ;;  %v2945_v5 = vld [vmem:[%s4525_s11] ss:$0 sm:$0xff]  ;;  %s4535_s28 = sld [smem:[#allocation48_spill]] (!%p2996_p3) }
 0x1e5   : > { %3101 = vmatprep.subr.bf16.mxu1 %v3725_v17  ;;  %s4529_s29 = scalar_lea.vmem %s4528_s15, %s4046_s4  ;;  %s4538_s15 = sld [smem:[#allocation49_spill]] (!%p2996_p3) }
 0x1e6   : > { %1148 = vmatpush1.bf16.msra.mxu0 %v3364_v27 }
 0x1e7   : > { %1149 = vmatprep.subr.bf16.mxu0 %v3365_v28 }
 0x1e8   : > { %3102 = vmatpush3.bf16.msra.mxu1 %v3378_v35 }
 0x1e9   : > { %3103 = vmatprep.subr.bf16.mxu1 %v3725_v17 }
 0x1ea   : > { %1150 = vmatpush1.bf16.msra.mxu0 %v3367_v29 }
 0x1eb   : > { %1151 = vmatprep.subr.bf16.mxu0 %v3368_v31 }
 0x1ec   : > { %3104 = vmatpush3.bf16.msra.mxu1 %v3379_v38 }
 0x1ed   : > { %3105 = vmatprep.subr.bf16.mxu1 %v3725_v17 }
 0x1ee   : > { %1152 = vmatpush1.bf16.msra.mxu0 %v3370_v33 }
 0x1ef   : > { %1153 = vmatprep.subr.bf16.mxu0 %v3371_v34 }
 0x1f0   : > { %3106 = vmatpush3.bf16.msra.mxu1 %v3380_v40 }
 0x1f1   : > { %3107 = vmatprep.subr.bf16.mxu1 %v3725_v17 }
 0x1f2   : > { %1154 = vmatpush1.bf16.msra.mxu0 %v3373_v36 }
 0x1f3   : > { %3153 = vmatprep.subr.bf16.mxu0 %v3725_v17 }
 0x1f4   : > { %3108 = vmatpush3.bf16.msra.mxu1 %v3381_v41 }
 0x1f5   : > { %1172 = vmatmul.mubr.bf16.vlgmr.msra.gmra.mxu0 %v961_v39  ;;  %3113 = vmatprep.subr.mxu1 %v3725_v17 }
 0x1f6   : > { %3169 = vmatprep.mubr.msk.bf16.mxu0 %vm3726_vm0, %v3725_v17 }
 0x1f7   : > { %3110 = vmatmul.mubr.bf16.vlgmr.msra.gmra.mxu1 %v961_v39 }
 0x1f8   : > { %3115 = vmatprep.mubr.msk.f32.mxu1 %vm3726_vm0, %v3725_v17 }
 0x2b5   : > { %v1173_v48 = vpop.f32.mrf.mxu0 }
 0x2b6   : > { %v1174_v54 = vadd.f32 %v1173_v48, %v999_v50 }
 0x2b7   : > { %v1175_v49 = vpop.f32.mrf.mxu0  ;;  %v1214_v55 = vpop.f32.mrf.mxu1 }
 0x2b8   : > { %v1176_v51 = vadd.f32 %v1175_v49, %v1003_v47  ;;  %v4180_v2 = vadd.f32 %v1214_v55, %v1007_v0 }
 0x2b9   : > { %v1177_v52 = vpop.f32.mrf.mxu0  ;;  %v3111_v56 = vpop.f32.mrf.mxu1 }
 0x2ba   : > { %1378 = vrot.lane.b32.xlu1 %v1176_v51, %s3727_s25  ;;  %1300 = vrot.lane.b32.xlu0 %v1176_v51, %s3728_s19 }
 0x2bb   : > { %3114 = vmatpush3.xpose.msk.msra.mxu1 %vm1221_vm1, %v1176_v51  ;;  %v1178_v53 = vpop.f32.mrf.mxu0  ;;  %v1217_v57 = vpop.f32.mrf.mxu1 }
 0x2bc   : > { %3118 = vmatprep.subr.mxu1 %v3725_v17 }
 0x2bd   : > { %v3112_v58 = vpop.f32.mrf.mxu1 }
 0x2be   : > { %3116 = vmatmul.mubr.msk.f32.vlgmr.msra.gmra.mxu1 %vm1221_vm1, %v1174_v54  ;;  %1376 = vrot.lane.b32.xlu1 %v1174_v54, %s3727_s25 }
 0x2bf   : > { %1298 = vrot.lane.b32.xlu0 %v1174_v54, %s3728_s19  ;;  %3120 = vmatprep.mubr.msk.f32.mxu1 %vm3726_vm0, %v3725_v17 }
 0x2c2   : > { %1454 = vrot.lane.b32.xlu1 %v1174_v54, %s3729_s2 }
 0x2c3   : > { %1456 = vrot.lane.b32.xlu0 %v1176_v51, %s3729_s2 }
 0x32c   : > { %v1301_v59 = vpop.permute.xlu0 %1300  ;;  %v1379_v60 = vpop.permute.xlu1 %1378 }
 0x32d   : > { %3119 = vmatpush3.xpose.msk.msra.mxu1 %vm1221_vm1, %v1301_v59 }
 0x32e   : > { %3123 = vmatprep.subr.mxu1 %v3725_v17 }
 0x330   : > { %v1377_v63 = vpop.permute.xlu1 %1376 }
 0x331   : > { %v1299_v62 = vpop.permute.xlu0 %1298 }
 0x332   : > { %3121 = vmatmul.mubr.msk.f32.vlgmr.msra.gmra.mxu1 %vm1221_vm1, %v1299_v62 }
 0x333   : > { %3124 = vmatpush3.xpose.msk.msra.mxu1 %vm1221_vm1, %v1379_v60  ;;  %3125 = vmatprep.mubr.msk.f32.mxu1 %vm3726_vm0, %v3725_v17 }
 0x334   : > { %3128 = vmatprep.subr.mxu1 %v3725_v17  ;;  %v1455_v3 = vpop.permute.xlu1 %1454 }
 0x335   : > { %v1457_v1 = vpop.permute.xlu0 %1456 }
 0x336   : > { %3126 = vmatmul.mubr.msk.f32.vlgmr.msra.gmra.mxu1 %vm1221_vm1, %v1377_v63 }
 0x337   : > { %3129 = vmatpush3.xpose.msk.msra.mxu1 %vm1221_vm1, %v1457_v1  ;;  %3130 = vmatprep.mubr.msk.f32.mxu1 %vm3726_vm0, %v3725_v17 }
 0x338   : > { %3133 = vmatprep.subr.mxu1 %v3725_v17 }
 0x33a   : > { %3131 = vmatmul.mubr.msk.f32.vlgmr.msra.gmra.mxu1 %vm1221_vm1, %v1455_v3  ;;  %v3383_v3 = vld [vmem:[%s4025_s30 + $0x30] sm:$0xff]  }
 0x33b   : > { %3134 = vmatpush3.msra.mxu1 %v4180_v2  ;;  %3135 = vmatprep.mubr.msk.f32.mxu1 %vm3726_vm0, %v3725_v17 }
 0x33c   : > { %3138 = vmatprep.subr.mxu1 %v3725_v17 }
 0x37e   : > { %v1294_v4 = vpop.f32.mrf.mxu1 }
 0x37f   : > { %v1532_v6 = vmul.f32 0.17677669, %v1294_v4  ;;  %v3384_v4 = vld [vmem:[%s4025_s30 + $0x28] sm:$0xff]  }
 0x380   : > { %v3117_v7 = vpop.f32.mrf.mxu1 }
 0x381   : > { %v1542_v8 = vadd.f32 %v2945_v5, %v1532_v6  ;;  %v3386_v7 = vld [vmem:[%s4025_s30 + $0x18] sm:$0xff]  }
 0x383   : > { %v1547_v9 = vsel %vm1546_vm2, %v1542_v8, -inf }
 0x384   : > { %1548 = vmax.xlane.f32.xlu0 %v1547_v9  ;;  %v3388_v9 = vld [vmem:[%s4025_s30 + $0x8] sm:$0xff]  }
 0x3f2   : > { %v1372_v10 = vpop.f32.mrf.mxu1 }
 0x3f3   : > { %v1533_v11 = vmul.f32 0.17677669, %v1372_v10  ;;  %v3389_v10 = vld [vmem:[%s4025_s30] sm:$0xff]  }
 0x3f4   : > { %v3122_v12 = vpop.f32.mrf.mxu1 }
 0x3f5   : > { %v1543_v13 = vadd.f32 %v2945_v5, %v1533_v11 }
 0x3f6   : > { %v1450_v14 = vpop.f32.mrf.mxu1 }
 0x3f7   : > { %v1534_v15 = vmul.f32 0.17677669, %v1450_v14  ;;  %v1550_v18 = vsel %vm1546_vm2, %v1543_v13, -inf }
 0x3f8   : > { %1551 = vmax.xlane.f32.xlu1 %v1550_v18  ;;  %v3127_v19 = vpop.f32.mrf.mxu1 }
 0x3f9   : > { %v1544_v20 = vadd.f32 %v2945_v5, %v1534_v15 }
 0x3fa   : > { %v1528_v21 = vpop.f32.mrf.mxu1 }
 0x3fb   : > { %v1535_v22 = vmul.f32 0.17677669, %v1528_v21  ;;  %v1553_v23 = vsel %vm1546_vm2, %v1544_v20, -inf }
 0x3fc   : > { %1554 = vmax.xlane.f32.xlu0 %v1553_v23  ;;  %v3132_v24 = vpop.f32.mrf.mxu1 }
 0x3fd   : > { %v1545_v25 = vadd.f32 %v2945_v5, %v1535_v22  ;;  %v3385_v5 = vld [vmem:[%s4025_s30 + $0x20] sm:$0xff]  }
 0x3ff   : > { %v1556_v26 = vsel %vm1546_vm2, %v1545_v25, -inf }
 0x400   : > { %1557 = vmax.xlane.f32.xlu0 %v1556_v26 }
 0x409   : > { %1665 = vrot.lane.b32.xlu1 %v4180_v2, %s3728_s19 }
 0x40d   : > { %v1549_v27 = vpop.xlane.xlu0 %1548 }
 0x40e   : > { %v1559_v28 = vsub.f32 %v1542_v8, %v1549_v27  ;;  %v3387_v8 = vld [vmem:[%s4025_s30 + $0x10] sm:$0xff]  }
 0x410   : > { %v1563_v29 = vmul.f32 1.442695, %v1559_v28 }
 0x412   : > { %3430 = vpow2.f32 %v1563_v29 }
 0x41f   : > { %v3431_v30 = vpop.eup %3430 }
 0x420   : > { %v1571_v31 = vsel %vm1546_vm2, %v3431_v30, 0.0 }
 0x42d   : > { %1572 = vadd.xlane.f32.xlu1 %v1571_v31 }
 0x481   : > { %v1552_v32 = vpop.xlane.xlu1 %1551 }
 0x482   : > { %v1560_v33 = vsub.f32 %v1543_v13, %v1552_v32  ;;  %v3390_v32 = vld [vmem:[%s4031_s14 + $0x70] ss:$8 sps:$4 sm:$0xff]  }
 0x484   : > { %v1565_v34 = vmul.f32 1.442695, %v1560_v33  ;;  %v3392_v33 = vld [vmem:[%s4031_s14 + $0x74] ss:$8 sps:$4 sm:$0xff]  }
 0x485   : > { %v1555_v35 = vpop.xlane.xlu0 %1554  ;;  %v1666_v51 = vpop.permute.xlu1 %1665 }
 0x486   : > { %3432 = vpow2.f32 %v1565_v34  ;;  %v1561_v36 = vsub.f32 %v1544_v20, %v1555_v35  ;;  %v3395_v34 = vld [vmem:[%s4031_s14 + $0x64] ss:$8 sps:$4 sm:$0xff]   ;;  %v3393_v35 = vld [vmem:[%s4031_s14 + $0x60] ss:$8 sps:$4 sm:$0xff]  }
 0x488   : > { %v1567_v38 = vmul.f32 1.442695, %v1561_v36 }
 0x489   : > { %v1558_v39 = vpop.xlane.xlu0 %1557 }
 0x48a   : > { %3434 = vpow2.f32 %v1567_v38  ;;  %v1562_v40 = vsub.f32 %v1545_v25, %v1558_v39  ;;  %v2950_v25 = vld [vmem:[%s4526_s18] ss:$0 sm:$0xff]  ;;  %s4536_s18 = smov (!%p2996_p3), %s4535_s28 }
 0x48c   : > { %v1569_v41 = vmul.f32 1.442695, %v1562_v40  ;;  %v3398_v40 = vld [vmem:[%s4031_s14 + $0x54] ss:$8 sps:$4 sm:$0xff]  }
 0x48e   : > { %3436 = vpow2.f32 %v1569_v41  ;;  %v3396_v41 = vld [vmem:[%s4031_s14 + $0x50] ss:$8 sps:$4 sm:$0xff]  }
 0x493   : > { %v3433_v42 = vpop.eup %3432 }
 0x494   : > { %v1574_v45 = vsel %vm1546_vm2, %v3433_v42, 0.0 }
 0x495   : > { %1575 = vadd.xlane.f32.xlu0 %v1574_v45  ;;  %v3401_v45 = vld [vmem:[%s4031_s14 + $0x44] ss:$8 sps:$4 sm:$0xff]  }
 0x497   : > { %v3435_v47 = vpop.eup %3434 }
 0x498   : > { %v1577_v48 = vsel %vm1546_vm2, %v3435_v47, 0.0 }
 0x499   : > { %1578 = vadd.xlane.f32.xlu1 %v1577_v48  ;;  %v3402_v48 = vld [vmem:[%s4031_s14 + $0x30] ss:$8 sps:$4 sm:$0xff]  }
 0x49b   : > { %v3437_v49 = vpop.eup %3436 }
 0x49c   : > { %v1580_v50 = vsel %vm1546_vm2, %v3437_v49, 0.0 }
 0x49d   : > { %1581 = vadd.xlane.f32.xlu0 %v1580_v50  ;;  %v3405_v50 = vld [vmem:[%s4031_s14 + $0x20] ss:$8 sps:$4 sm:$0xff]  }
 0x4aa   : > { %1817 = vrot.lane.b32.xlu1 %v4180_v2, %s3729_s2 }
 0x4b3   : > { %1741 = vrot.lane.b32.xlu0 %v4180_v2, %s3727_s25  ;;  %v3382_v2 = vld [vmem:[%s4025_s30 + $0x38] sm:$0xff]  }
 0x4b4   : > { %3154 = vmatpush3.bf16.msra.mxu0 %v3382_v2 }
 0x4b5   : > { %3155 = vmatprep.subr.bf16.mxu0 %v3725_v17 }
 0x4b6   : > { %v1573_v52 = vpop.xlane.xlu1 %1572 }
 0x4b7   : > { %3438 = vrcp.f32 %v1573_v52  ;;  %v3408_v52 = vld [vmem:[%s4031_s14 + $0x10] ss:$8 sps:$4 sm:$0xff]  }
 0x4b8   : > { %3156 = vmatpush3.bf16.msra.mxu0 %v3383_v3  ;;  %v3416_v3 = vld [vmem:[%s4527_s12 + $0x70] sm:$0xff]  }
 0x4b9   : > { %3157 = vmatprep.subr.bf16.mxu0 %v3725_v17 }
 0x4bc   : > { %3158 = vmatpush3.bf16.msra.mxu0 %v3384_v4  ;;  %v3417_v4 = vld [vmem:[%s4527_s12 + $0x30] sm:$0xff]  }
 0x4bd   : > { %3159 = vmatprep.subr.bf16.mxu0 %v3725_v17 }
 0x4c0   : > { %3160 = vmatpush3.bf16.msra.mxu0 %v3385_v5  ;;  %v3418_v5 = vld [vmem:[%s4527_s12 + $0x68] sm:$0xff]  }
 0x4c1   : > { %3161 = vmatprep.subr.bf16.mxu0 %v3725_v17 }
 0x4c4   : > { %v3439_v53 = vpop.eup %3438  ;;  %3162 = vmatpush3.bf16.msra.mxu0 %v3386_v7  ;;  %v3420_v7 = vld [vmem:[%s4527_s12 + $0x60] sm:$0xff]  }
 0x4c5   : > { %v1587_v54 = vmul.f32 %v3439_v53, %v3431_v30  ;;  %3163 = vmatprep.subr.bf16.mxu0 %v3725_v17  ;;  %v3413_v53 = vld [vmem:[%s4031_s14 + $0x4] ss:$8 sps:$4 sm:$0xff]  }
 0x4c7   : > { %3136 = vmatmul.mubr.msk.f32.vlgmr.msra.gmra.mxu1 %vm1546_vm2, %v1587_v54  ;;  %v3411_v54 = vld [vmem:[%s4031_s14] ss:$8 sps:$4 sm:$0xff]  }
 0x4c8   : > { %3139 = vmatpush3.msra.mxu1 %v1666_v51  ;;  %3140 = vmatprep.mubr.msk.f32.mxu1 %vm3726_vm0, %v3725_v17  ;;  %v3410_v51 = vld [vmem:[%s4031_s14 + $0x14] ss:$8 sps:$4 sm:$0xff]  }
 0x4c9   : > { %3143 = vmatprep.subr.mxu1 %v3725_v17  ;;  %3164 = vmatpush3.bf16.msra.mxu0 %v3387_v8  ;;  %v3422_v8 = vld [vmem:[%s4527_s12 + $0x58] sm:$0xff]  }
 0x4ca   : > { %3165 = vmatprep.subr.bf16.mxu0 %v3725_v17 }
 0x4cd   : > { %3166 = vmatpush3.bf16.msra.mxu0 %v3388_v9  ;;  %v3423_v9 = vld [vmem:[%s4527_s12 + $0x18] sm:$0xff]  }
 0x4ce   : > { %3167 = vmatprep.subr.bf16.mxu0 %v3725_v17 }
 0x4d1   : > { %3168 = vmatpush3.bf16.msra.mxu0 %v3389_v10  ;;  %v3424_v10 = vld [vmem:[%s4527_s12 + $0x50] sm:$0xff]  }
 0x51e   : > { %v1576_v55 = vpop.xlane.xlu0 %1575 }
 0x51f   : > { %3440 = vrcp.f32 %v1576_v55  ;;  %v3414_v55 = vld [vmem:[%s4527_s12 + $0x78] sm:$0xff]  }
 0x520   : > { %3053 = vmatprep.subr.bf16.mxu0 %v3414_v55 }
 0x522   : > { %v1579_v56 = vpop.xlane.xlu1 %1578 }
 0x523   : > { %3442 = vrcp.f32 %v1579_v56  ;;  %v3415_v56 = vld [vmem:[%s4527_s12 + $0x38] sm:$0xff]  }
 0x526   : > { %v1582_v57 = vpop.xlane.xlu0 %1581  ;;  %v1818_v63 = vpop.permute.xlu1 %1817 }
 0x527   : > { %3444 = vrcp.f32 %v1582_v57 }
 0x52a   : > { %v1742_v60 = vpop.permute.xlu0 %1741 }
 0x52c   : > { %v3441_v58 = vpop.eup %3440 }
 0x52d   : > { %v1588_v59 = vmul.f32 %v3441_v58, %v3433_v42  ;;  %v3399_v42 = vld [vmem:[%s4031_s14 + $0x40] ss:$8 sps:$4 sm:$0xff]  }
 0x52f   : > { %3141 = vmatmul.mubr.msk.f32.vlgmr.msra.gmra.mxu1 %vm1546_vm2, %v1588_v59 }
 0x530   : > { %v3443_v61 = vpop.eup %3442  ;;  %3144 = vmatpush3.msra.mxu1 %v1742_v60  ;;  %3145 = vmatprep.mubr.msk.f32.mxu1 %vm3726_vm0, %v3725_v17 }
 0x531   : > { %3148 = vmatprep.subr.mxu1 %v3725_v17  ;;  %v1589_v62 = vmul.f32 %v3443_v61, %v3435_v47  ;;  %v3404_v47 = vld [vmem:[%s4031_s14 + $0x34] ss:$8 sps:$4 sm:$0xff]   ;;  %v2959_v61 = vld [vmem:[%s4529_s29] ss:$0 sm:$0xff] }
 0x533   : > { %3146 = vmatmul.mubr.msk.f32.vlgmr.msra.gmra.mxu1 %vm1546_vm2, %v1589_v62 }
 0x534   : > { %v3445_v0 = vpop.eup %3444  ;;  %3149 = vmatpush3.msra.mxu1 %v1818_v63  ;;  %3150 = vmatprep.mubr.msk.f32.mxu1 %vm3726_vm0, %v3725_v17  ;;  %v2960_v63 = vld [vmem:[%s911_s23] ss:$0 sm:$0xff] }
 0x535   : > { %v1590_v1 = vmul.f32 %v3445_v0, %v3437_v49  ;;  %2160 = vmatprep.subr.bf16.mxu1 %v3392_v33  ;;  %v3407_v49 = vld [vmem:[%s4031_s14 + $0x24] ss:$8 sps:$4 sm:$0xff]  }
 0x537   : > { %3151 = vmatmul.mubr.msk.f32.vlgmr.msra.gmra.mxu1 %vm1546_vm2, %v1590_v1 }
 0x538   : > { %2192 = vmatprep.mubr.bf16.mxu1 %v3724_v16  ;;  %2161 = vmatpush1.bf16.msra.mxu1 %v3390_v32 }
 0x539   : > { %2162 = vmatprep.subr.bf16.mxu1 %v3395_v34 }
 0x53c   : > { %2163 = vmatpush1.bf16.msra.mxu1 %v3393_v35 }
 0x53d   : > { %2164 = vmatprep.subr.bf16.mxu1 %v3398_v40 }
 0x540   : > { %2165 = vmatpush1.bf16.msra.mxu1 %v3396_v41 }
 0x541   : > { %2166 = vmatprep.subr.bf16.mxu1 %v3401_v45 }
 0x544   : > { %2167 = vmatpush1.bf16.msra.mxu1 %v3399_v42 }
 0x545   : > { %2168 = vmatprep.subr.bf16.mxu1 %v3404_v47 }
 0x548   : > { %2169 = vmatpush1.bf16.msra.mxu1 %v3402_v48 }
 0x549   : > { %2170 = vmatprep.subr.bf16.mxu1 %v3407_v49 }
 0x54c   : > { %2171 = vmatpush1.bf16.msra.mxu1 %v3405_v50 }
 0x54d   : > { %2172 = vmatprep.subr.bf16.mxu1 %v3410_v51 }
 0x550   : > { %2173 = vmatpush1.bf16.msra.mxu1 %v3408_v52 }
 0x551   : > { %2174 = vmatprep.subr.bf16.mxu1 %v3413_v53 }
 0x554   : > { %2175 = vmatpush1.bf16.msra.mxu1 %v3411_v54  ;;  %v2994_v54 = vld [vmem:[%s921_s10] ss:$0 sm:$0xff] }
 0x587   : > { %v1660_v6 = vpop.f32.mrf.mxu1 }
 0x589   : > { %v3137_v16 = vpop.f32.mrf.mxu1 }
 0x58a   : > { %v3421_v16 = vld [vmem:[%s4527_s12 + $0x20] sm:$0xff]  }
 0x5ef   : > { %v1737_v11 = vpop.f32.mrf.mxu1 }
 0x5f0   : > { %1894 = vrot.lane.b32.xlu1 %v1737_v11, %s3729_s2  ;;  %v3425_v11 = vld [vmem:[%s4527_s12 + $0x10] sm:$0xff]  }
 0x5f1   : > { %v3142_v12 = vpop.f32.mrf.mxu1 }
 0x5f2   : > { %v3426_v12 = vld [vmem:[%s4527_s12 + $0x48] sm:$0xff]  }
 0x5f3   : > { %v1813_v13 = vpop.f32.mrf.mxu1 }
 0x5f4   : > { %1898 = vrot.lane.b32.xlu0 %v1813_v13, %s3727_s25  ;;  %v3427_v13 = vld [vmem:[%s4527_s12 + $0x8] sm:$0xff]  }
 0x5f5   : > { %v3147_v14 = vpop.f32.mrf.mxu1 }
 0x5f6   : > { %v3428_v14 = vld [vmem:[%s4527_s12 + $0x40] sm:$0xff]  }
 0x5f7   : > { %v1889_v15 = vpop.f32.mrf.mxu1 }
 0x5f8   : > { %1902 = vrot.lane.b32.xlu1 %v1889_v15, %s3728_s19  ;;  %v3429_v15 = vld [vmem:[%s4527_s12] sm:$0xff]  }
 0x5f9   : > { %v3152_v18 = vpop.f32.mrf.mxu1 }
 0x5fa   : > { %v2068_v18 = vld [vmem:[%s4082_s16] sm:$0x3] }
 0x662   : > { %v1895_v19 = vpop.permute.xlu1 %1894 }
 0x663   : > { %v1905_v17 = vsel %vm1221_vm1, %v1660_v6, %v1895_v19  ;;  %v3419_v6 = vld [vmem:[%s4527_s12 + $0x28] sm:$0xff]   ;;  %v2073_v19 = vrot.slane %v2068_v18, %v998_v46  ;;  %s4537_s12 = sld [smem:[#allocation47_spill]] (!%p2996_p3) }
 0x666   : > { %v1899_v20 = vpop.permute.xlu0 %1898 }
 0x667   : > { %v1907_v21 = vsel %vm1906_vm3, %v1905_v17, %v1899_v20  ;;  %v2077_v20 = vrot.slane %v2068_v18, %v1002_v44 }
 0x66a   : > { %v1903_v22 = vpop.permute.xlu1 %1902 }
 0x66b   : > { %v1909_v23 = vsel %vm1908_vm4, %v1907_v21, %v1903_v22 }
 0x66c   : > { %v1910_v24 = vpack.c.bf16 %v1909_v23, %v1909_v23 }
 0x66e   : > { %3170 = vmatmul.mubr.bf16.vlgmr.msra.gmra.mxu0 %v1910_v24 }
 0x66f   : > { %3054 = vmatpush3.bf16.msra.mxu0 %v3415_v56  ;;  %v2995_v56 = vld [vmem:[%s924_s8] ss:$0 sm:$0xff] }
 0x670   : > { %3055 = vmatprep.subr.bf16.mxu0 %v3416_v3 }
 0x673   : > { %3056 = vmatpush3.bf16.msra.mxu0 %v3417_v4 }
 0x674   : > { %3057 = vmatprep.subr.bf16.mxu0 %v3418_v5 }
 0x677   : > { %3058 = vmatpush3.bf16.msra.mxu0 %v3419_v6 }
 0x678   : > { %3059 = vmatprep.subr.bf16.mxu0 %v3420_v7 }
 0x67b   : > { %3060 = vmatpush3.bf16.msra.mxu0 %v3421_v16 }
 0x67c   : > { %3061 = vmatprep.subr.bf16.mxu0 %v3422_v8 }
 0x67f   : > { %3062 = vmatpush3.bf16.msra.mxu0 %v3423_v9 }
 0x680   : > { %3063 = vmatprep.subr.bf16.mxu0 %v3424_v10 }
 0x683   : > { %3064 = vmatpush3.bf16.msra.mxu0 %v3425_v11 }
 0x684   : > { %3065 = vmatprep.subr.bf16.mxu0 %v3426_v12 }
 0x687   : > { %3066 = vmatpush3.bf16.msra.mxu0 %v3427_v13 }
 0x688   : > { %3067 = vmatprep.subr.bf16.mxu0 %v3428_v14 }
 0x68b   : > { %3068 = vmatpush3.bf16.msra.mxu0 %v3429_v15 }
 0x72e   : > { %v2016_v26 = vpop.f32.mrf.mxu0 }
 0x72f   : > { %v2017_v27 = vadd.f32 %v2950_v25, %v2016_v26 }
 0x730   : > { %v3171_v28 = vpop.f32.mrf.mxu0 }
 0x731   : > { %v2022_v29 = vadd.f32 %v2017_v27, %v4131_v37 }
 0x732   : > { %v2019_v30 = vpop.f32.mrf.mxu0 }
 0x733   : > { %2025 = vadd.xlane.f32.xlu0 %v2022_v29 }
 0x734   : > { %v3172_v31 = vpop.f32.mrf.mxu0 }
 0x7bc   : > { %v2026_v36 = vpop.xlane.xlu0 %2025 }
 0x7bd   : > { %v2028_v37 = vmul.f32 0.0078125, %v2026_v36  ;;  %v2977_v36 = vld [vmem:[%s918_s26] ss:$0 sm:$0xff] }
 0x7bf   : > { %v2029_v38 = vsub.f32 %v2022_v29, %v2028_v37 }
 0x7c1   : > { %v2030_v39 = vmul.f32 %v2029_v38, %v2029_v38 }
 0x7c3   : > { %2031 = vadd.xlane.f32.xlu1 %v2030_v39 }
 0x84c   : > { %v2032_v57 = vpop.xlane.xlu1 %2031 }
 0x84d   : > { %v2033_v58 = vmul.f32 0.0078125, %v2032_v57 }
 0x84f   : > { %v2034_v59 = vadd.f32 1e-05, %v2033_v58 }
 0x851   : > { %3446 = vrsqrt.f32 %v2034_v59 }
 0x85e   : > { %v3447_v60 = vpop.eup %3446 }
 0x85f   : > { %v2036_v62 = vmul.f32 %v3447_v60, %v2029_v38 }
 0x861   : > { %v2043_v0 = vmul.f32 %v2959_v61, %v2036_v62 }
 0x863   : > { %v4273_v1 = vadd.f32 %v2960_v63, %v2043_v0 }
 0x865   : > { %v2051_v2 = vpack.c.bf16 %v4273_v1, %v4273_v1 }
 0x867   : > { %2193 = vmatmul.mubr.bf16.vlgmr.msra.gmra.mxu1 %v2051_v2 }
 0x927   : > { %v2194_v17 = vpop.f32.mrf.mxu1 }
 0x928   : > { %v2195_v21 = vadd.f32 %v2194_v17, %v2073_v19 }
 0x929   : > { %v2196_v22 = vpop.f32.mrf.mxu1 }
 0x92a   : > { %v2203_v23 = vmul.f32 0.70710677, %v2195_v21  ;;  %v2197_v24 = vadd.f32 %v2196_v22, %v2077_v20  ;;  %v2201_v31 = vmul.f32 0.5, %v2195_v21 }
 0x92b   : > { %v2198_v25 = vpop.f32.mrf.mxu1 }
 0x92c   : > { %3448 = verf.f32 %v2203_v23  ;;  %v2204_v26 = vmul.f32 0.70710677, %v2197_v24  ;;  %v2202_v32 = vmul.f32 0.5, %v2197_v24 }
 0x92d   : > { %v2199_v27 = vpop.f32.mrf.mxu1 }
 0x92e   : > { %3450 = verf.f32 %v2204_v26 }
 0x939   : > { %v3449_v28 = vpop.eup %3448 }
 0x93a   : > { %v2207_v29 = vadd.f32 1.0, %v3449_v28 }
 0x93b   : > { %v3451_v30 = vpop.eup %3450 }
 0x93c   : > { %v2208_v46 = vadd.f32 1.0, %v3451_v30  ;;  %v2209_v33 = vmul.f32 %v2207_v29, %v2201_v31 }
 0x93e   : > { %v2210_v43 = vmul.f32 %v2208_v46, %v2202_v32  ;;  %v2211_v34 = vpack.c.bf16 %v2209_v33, %v2209_v33 }
 0x940   : > { %v2212_v44 = vpack.c.bf16 %v2210_v43, %v2210_v43 }
 0x942   : > { %2380 = vmatprep.mubr.bf16.mxu0 %v2212_v44 }
 0x943   : > { %2381 = vmatmul.mubr.bf16.vlgmr.msra.gmra.mxu0 %v2211_v34 }
 0xa03   : > { %v3069_v35 = vpop.f32.mrf.mxu0 }
 0xa05   : > { %v3070_v37 = vpop.f32.mrf.mxu0 }
 0xa06   : > { %v3071_v38 = vadd.f32 %v3070_v37, %v3069_v35 }
 0xa07   : > { %v3072_v39 = vpop.f32.mrf.mxu0 }
 0xa08   : > { %v2383_v40 = vadd.f32 %v3071_v38, %v2977_v36 }
 0xa09   : > { %v3073_v41 = vpop.f32.mrf.mxu0 }
 0xa0a   : > { %v2388_v42 = vadd.f32 %v2383_v40, %v4273_v1 }
 0xa0c   : > { %2391 = vadd.xlane.f32.xlu0 %v2388_v42 }
 0xa95   : > { %v2392_v45 = vpop.xlane.xlu0 %2391 }
 0xa96   : > { %v2393_v47 = vmul.f32 0.0078125, %v2392_v45 }
 0xa98   : > { %v2394_v48 = vsub.f32 %v2388_v42, %v2393_v47 }
 0xa9a   : > { %v2395_v49 = vmul.f32 %v2394_v48, %v2394_v48 }
 0xa9c   : > { %2396 = vadd.xlane.f32.xlu0 %v2395_v49 }
 0xb25   : > { %v2397_v50 = vpop.xlane.xlu0 %2396 }
 0xb26   : > { %v2398_v51 = vmul.f32 0.0078125, %v2397_v50 }
 0xb28   : > { %v2399_v52 = vadd.f32 1e-05, %v2398_v51 }
 0xb2a   : > { %3452 = vrsqrt.f32 %v2399_v52 }
 0xb37   : > { %v3453_v53 = vpop.eup %3452 }
 0xb38   : > { %v2401_v55 = vmul.f32 %v3453_v53, %v2394_v48 }
 0xb3a   : > { %v2408_v57 = vmul.f32 %v2994_v54, %v2401_v55  ;;  %2420 = sbr.rel (%p2996_p3) target bundleno = 3322 (0xcfa), region = 124 }
 0xb3c   : > { %v2415_v58 = vadd.f32 %v2995_v56, %v2408_v57 }
 0xb3e   : > { %2416 = vst [vmem:[#allocation2] sm:$0xff] %v2415_v58 }
 0xb3f   : > { %v3454_v59 = vld [vmem:[%s4534_s6 + $0x38] sm:$0xff]   ;;  %v3730_v60 = vmov 0.0   ;;  %v3455_v61 = vld [vmem:[%s4534_s6 + $0x30] sm:$0xff]   ;;  %vm3731_vm5 = vmmov 0   ;;  %v3456_v62 = vld [vmem:[%s4534_s6 + $0x28] sm:$0xff]   ;;  %v2421_v7 = vpack.c.bf16 %v2415_v58, %v2415_v58 }
 0xb40   : > { %3173 = vmatprep.subr.bf16.mxu0 %v3730_v60  ;;  %3193 = vmatprep.subr.bf16.mxu1 %v3730_v60  ;;  %v3462_v63 = vld [vmem:[%s4535_s28 + $0x38] sm:$0xff]   ;;  %v3457_v0 = vld [vmem:[%s4534_s6 + $0x20] sm:$0xff]   ;;  %v3463_v1 = vld [vmem:[%s4536_s18 + $0x30] sm:$0xff]  }
 0xb41   : > { %3174 = vmatpush3.bf16.msra.mxu0 %v3454_v59  ;;  %3189 = vmatprep.mubr.msk.bf16.mxu0 %vm3731_vm5, %v3730_v60  ;;  %v3458_v2 = vld [vmem:[%s4534_s6 + $0x18] sm:$0xff]   ;;  %v3464_v3 = vld [vmem:[%s4536_s18 + $0x28] sm:$0xff]   ;;  %v3459_v4 = vld [vmem:[%s4534_s6 + $0x10] sm:$0xff]  }
 0xb42   : > { %3175 = vmatprep.subr.bf16.mxu0 %v3730_v60  ;;  %3209 = vmatprep.mubr.msk.bf16.mxu1 %vm3731_vm5, %v3730_v60  ;;  %v3460_v5 = vld [vmem:[%s4534_s6 + $0x8] sm:$0xff]   ;;  %v3461_v6 = vld [vmem:[%s4534_s6] sm:$0xff]   ;;  %v3466_v8 = vld [vmem:[%s4536_s18 + $0x18] sm:$0xff]  }
 0xb43   : > { %3194 = vmatpush3.bf16.msra.mxu1 %v3462_v63  ;;  %v3465_v16 = vld [vmem:[%s4536_s18 + $0x20] sm:$0xff]   ;;  %v3467_v9 = vld [vmem:[%s4536_s18 + $0x10] sm:$0xff]   ;;  %v3468_v10 = vld [vmem:[%s4536_s18 + $0x8] sm:$0xff]  }
 0xb44   : > { %3195 = vmatprep.subr.bf16.mxu1 %v3730_v60  ;;  %v3469_v11 = vld [vmem:[%s4536_s18] sm:$0xff]  }
 0xb45   : > { %3176 = vmatpush3.bf16.msra.mxu0 %v3455_v61  ;;  %v2438_v12 = vld [vmem:[%s4537_s12] sm:$0x1] }
 0xb46   : > { %3177 = vmatprep.subr.bf16.mxu0 %v3730_v60  ;;  %v2545_v21 = vld [vmem:[%s4538_s15] sm:$0x1] }
 0xb47   : > { %3196 = vmatpush3.bf16.msra.mxu1 %v3463_v1 }
 0xb48   : > { %3197 = vmatprep.subr.bf16.mxu1 %v3730_v60 }
 0xb49   : > { %3178 = vmatpush3.bf16.msra.mxu0 %v3456_v62 }
 0xb4a   : > { %3179 = vmatprep.subr.bf16.mxu0 %v3730_v60 }
 0xb4b   : > { %3198 = vmatpush3.bf16.msra.mxu1 %v3464_v3 }
 0xb4c   : > { %3199 = vmatprep.subr.bf16.mxu1 %v3730_v60 }
 0xb4d   : > { %3180 = vmatpush3.bf16.msra.mxu0 %v3457_v0 }
 0xb4e   : > { %3181 = vmatprep.subr.bf16.mxu0 %v3730_v60 }
 0xb4f   : > { %3200 = vmatpush3.bf16.msra.mxu1 %v3465_v16 }
 0xb50   : > { %3201 = vmatprep.subr.bf16.mxu1 %v3730_v60 }
 0xb51   : > { %3182 = vmatpush3.bf16.msra.mxu0 %v3458_v2 }
 0xb52   : > { %3183 = vmatprep.subr.bf16.mxu0 %v3730_v60 }
 0xb53   : > { %3202 = vmatpush3.bf16.msra.mxu1 %v3466_v8 }
 0xb54   : > { %3203 = vmatprep.subr.bf16.mxu1 %v3730_v60 }
 0xb55   : > { %3184 = vmatpush3.bf16.msra.mxu0 %v3459_v4 }
 0xb56   : > { %3185 = vmatprep.subr.bf16.mxu0 %v3730_v60 }
 0xb57   : > { %3204 = vmatpush3.bf16.msra.mxu1 %v3467_v9 }
 0xb58   : > { %3205 = vmatprep.subr.bf16.mxu1 %v3730_v60 }
 0xb59   : > { %3186 = vmatpush3.bf16.msra.mxu0 %v3460_v5 }
 0xb5a   : > { %3187 = vmatprep.subr.bf16.mxu0 %v3730_v60 }
 0xb5b   : > { %3206 = vmatpush3.bf16.msra.mxu1 %v3468_v10 }
 0xb5c   : > { %3207 = vmatprep.subr.bf16.mxu1 %v3730_v60 }
 0xb5d   : > { %3188 = vmatpush3.bf16.msra.mxu0 %v3461_v6 }
 0xb5f   : > { %3208 = vmatpush3.bf16.msra.mxu1 %v3469_v11 }
 0xb60   : > { %3190 = vmatmul.mubr.bf16.vlgmr.msra.gmra.mxu0 %v2421_v7 }
 0xc20   : > { %v2521_v13 = vpop.f32.mrf.mxu0 }
 0xc21   : > { %v2522_v14 = vadd.f32 %v2521_v13, %v2438_v12 }
 0xc22   : > { %v3191_v15 = vpop.f32.mrf.mxu0 }
 0xc23   : > { %3470 = vtanh.f32 %v2522_v14 }
 0xc24   : > { %v2524_v18 = vpop.f32.mrf.mxu0 }
 0xc26   : > { %v3192_v19 = vpop.f32.mrf.mxu0 }
 0xc30   : > { %v3471_v20 = vpop.eup %3470 }
 0xc31   : > { %v2528_v17 = vpack.c.bf16 %v3471_v20, %v3471_v20 }
 0xc33   : > { %3210 = vmatmul.mubr.bf16.vlgmr.msra.gmra.mxu1 %v2528_v17 }
 0xcf3   : > { %v2628_v22 = vpop.f32.mrf.mxu1 }
 0xcf4   : > { %v2629_v23 = vadd.f32 %v2628_v22, %v2545_v21 }
 0xcf5   : > { %v3211_v24 = vpop.f32.mrf.mxu1 }
 0xcf6   : > { %2634 = vst [vmem:[%s4094_s1] sm:$0x1] %v2629_v23 }
 0xcf7   : > { %v2631_v25 = vpop.f32.mrf.mxu1 }
 0xcf9   : > { %v3212_v26 = vpop.f32.mrf.mxu1 }
 0xcfa PF: > { %s4539_s29 = sld [smem:[#allocation20_spill]]  ;;  %s2648_s0 = sshll.u32 %s4094_s1, 4  ;;  %s2649_s0 = int_to_ptr.vmem [resolvable:$true] %s2648_s0 }
 0xcfb   : > { %s4541_s23 = sld [smem:[#allocation50_spill]]  ;;  %s4543_s24 = sand.u32 1, %s3676_s22  }
 0xcfc   : > { %s2636_s25 = scalar_lea.sflag [#allocation5], %s4543_s24  ;;  %s3584_s19 = scalar_lea.vmem %s2649_s0, 16 }
 0xcfd   : > { %p3585_p13 = scmp.ne.s32.totalorder %s2649_s0, %s3584_s19  ;;  %s3732_s2 = smov [#allocation11]  }
 0xcfe   : > { %s3588_s20 = sshll.u32 %s3732_s2, 4  ;;  %s3589_s20 = int_to_ptr.vmem [resolvable:$false] %s3588_s20 }
 0xcff   : > { %p3586_p0 = pnand %p3585_p13, %p3930_p12  ;;  %s3590_s21 = scalar_lea.vmem %s3589_s20, 32 }
 0xd00   : > { %s3013_s9 = sshll.u32 %s4539_s29, 4  ;;  %p3591_p7 = scmp.lt.s32.totalorder %s2649_s0, %s3589_s20 }
 0xd01   : > { %s4542_s13 = smov %s4541_s23  ;;  %s2646_s26 = scalar_lea.hbm %s4541_s23, %s3013_s9 }
 0xd02   : > { %p3587_p1 = pneg %p3586_p0  ;;  %p3592_p9 = scmp.lt.s32.totalorder %s3590_s21, %s3584_s19 }
 0xd04   : > { %p3593_p5 = por %p3592_p9, %p3591_p7 }
 0xd06   : > { %p3594_p10 = pnand %p3593_p5, %p3587_p1 }
 0xd08   : > { %3597 = shalt.err (!%p3594_p10)
}
 0xd09   : > { %s3598_s10 = scalar_lea.hbm %s2646_s26, 16  ;;  %s3602_s8 = scalar_lea.hbm %s4542_s13, 32 }
 0xd0a   : > { %p3599_p11 = scmp.ne.s32.totalorder %s2646_s26, %s3598_s10  ;;  %p3603_p8 = scmp.lt.s32.totalorder %s2646_s26, %s4542_s13 }
 0xd0b   : > { %p3604_p3 = scmp.lt.s32.totalorder %s3602_s8, %s3598_s10 }
 0xd0c   : > { %p3600_p4 = pnand %p3599_p11, %p3930_p12 }
 0xd0d   : > { %p3605_p13 = por %p3604_p3, %p3603_p8 }
 0xd0e   : > { %p3601_p6 = pneg %p3600_p4 }
 0xd10   : > { %p3606_p0 = pnand %p3605_p13, %p3601_p6 }
 0xd12   : > { %3609 = shalt.err (!%p3606_p0)
}
 0xd13   : > { %3225 = dma.vmem_to_hbm [thread:$0]  (%p3930_p12), %s2649_s0, 16, %s2646_s26, %s2636_s25  }
 0xd14 PF: > { %s4544_s30 = sld [smem:[#allocation23_spill]] }
 0xd15   : > { %s4545_s28 = sld [smem:[#allocation16_spill]] }
 0xd1a   : > { %p3245_p1 = scmp.ge.s32.totalorder %s4544_s30, 2 }
 0xd1b   : > { %s2660_s27 = sand.u32 1, %s4545_s28  }
 0xd1c   : > { %p3241_p7 = pnand %p3245_p1, %p3940_p2  ;;  %s2661_s17 = scalar_lea.sflag [#allocation5], %s2660_s27 }
 0xd1e   : > { %p3242_p9 = pneg %p3241_p7 }
 0xd20   : > { %3667 = dma.done.wait (%p3242_p9), %s2661_s17, 16  }
 0xd21   : > { %3669 = vsyncadd (%p3242_p9), %s2661_s17, 4294967280  ;;  %s42_s4 = sadd.s32 1, %s4544_s30   ;;  %s4547_s15 = sld [smem:[#allocation17_spill]] }
 0xd22   : > { %p39_p5 = scmp.ge.s32.totalorder %s42_s4, 18   ;;  %s4548_s23 = sld [smem:[#allocation27_spill]] }
 0xd23   : > { %s4549_s24 = sld [smem:[#allocation18_spill]]  ;;  %s4556_s1 = smov %s3676_s22 }
 0xd24   : > { %s4550_s2 = sld [smem:[#allocation19_spill]] }
 0xd25   : > { %s4551_s25 = sld [smem:[#allocation26_spill]]  ;;  %41 = sbr.rel (!%p39_p5) target bundleno = 34 (0x22), region = 220 }
 0xd26   : > { %s4552_s3 = sld [smem:[#allocation21_spill]] }
 0xd27   : > { %s4553_s26 = sld [smem:[#allocation22_spill]]  ;;  %s4557_s22 = smov %s4547_s15 }
 0xd28   : > { %s4554_s27 = sld [smem:[#allocation24_spill]] }
 0xd29   : > { %s4555_s28 = sld [smem:[#allocation25_spill]] }
 0xd2a   :  { %2665 = vsyncpa [#allocation4], 1 }
 0xd2b   :  { %2667 = vsyncpa [#allocation4 + $0x1], 1 }
 0xd2c   :  { %2668 = vsyncpa [#allocation7], 1 }
 0xd2d   :  { %2670 = vsyncpa [#allocation7 + $0x1], 1 }
 0xd2e   :  { %2671 = vsyncpa [#allocation10], 1 }
 0xd2f   :  { %2673 = vsyncpa [#allocation10 + $0x1], 1 }
 0xd30   :  { %2674 = vsyncpa [#allocation5], 1 }
 0xd31   :  { %2676 = vsyncpa [#allocation5 + $0x1], 1 }

</bundles_post_ra>
